<compile_context>
chip_gen: v6e
topology: v6e:2x2x1
jax: 0.10.0
libtpu: 0.0.40
codegen_flags: <defaults>
</compile_context>

<pallas_src>
import jax
import jax.numpy as jnp
from jax.experimental import pallas as pl
from jax.experimental.pallas import tpu as pltpu

LANE = 128          # lane width: channel padding target
_MAX_TILE_M = 512   # M-tile upper bound (multiple of 8, fits VMEM on all gens)
_VMEM_LIMIT = 32 * 1024 * 1024   # safe on v5e/v6e/v7x
_ACT_DTYPE = jnp.bfloat16        # inter-layer activation storage dtype


def _round_up(a, b):
  return (a + b - 1) // b * b


def _choose_tile_m(m):
  return min(_MAX_TILE_M, _round_up(m, 8))


# ----------------------------- Pallas kernels -----------------------------

def _make_conv_kernel(apply_relu, has_residual):
  """Fused-K matmul + (shift [+ residual] [+ ReLU]) epilogue for one M tile."""

  if has_residual:
    def kernel(x_ref, w_ref, shift_ref, res_ref, o_ref):
      acc = jnp.dot(x_ref[...], w_ref[...], preferred_element_type=jnp.float32)
      y = acc + shift_ref[...] + res_ref[...].astype(jnp.float32)
      if apply_relu:
        y = jnp.maximum(y, 0.0)
      o_ref[...] = y.astype(o_ref.dtype)
  else:
    def kernel(x_ref, w_ref, shift_ref, o_ref):
      acc = jnp.dot(x_ref[...], w_ref[...], preferred_element_type=jnp.float32)
      y = acc + shift_ref[...]
      if apply_relu:
        y = jnp.maximum(y, 0.0)
      o_ref[...] = y.astype(o_ref.dtype)

  return kernel


def _maxpool_kernel(taps_ref, o_ref):
  # taps_ref: (T, tile_m, C) -> elementwise max over taps for this M tile.
  o_ref[...] = jnp.max(taps_ref[...], axis=0)


def _avgpool_kernel(x_ref, o_ref):
  # x_ref: (N, H*W, C) -> f32 mean over spatial axis.
  o_ref[...] = jnp.mean(x_ref[...].astype(jnp.float32), axis=1)


# ------------------------------ JAX glue ops -------------------------------

def _im2col(xpad, kh, kw, stride, dilation, oh, ow):
  """xpad (N,Hp,Wp,C) -> fused-K slab (N*oh*ow, kh*kw*C); col order (kh,kw,C)."""
  cols = []
  for i in range(kh):
    for j in range(kw):
      h0 = i * dilation
      w0 = j * dilation
      sl = xpad[:, h0:h0 + (oh - 1) * stride + 1:stride,
                w0:w0 + (ow - 1) * stride + 1:stride, :]
      cols.append(sl)
  patch = jnp.concatenate(cols, axis=-1)            # (N, oh, ow, kh*kw*C)
  return patch.reshape(-1, kh * kw * xpad.shape[-1])


def conv2d_bn_act(x, wk, shift, *, stride=1, padding=0, dilation=1,
                  relu=True, residual=None):
  """x: (N,H,W,Cin) bf16 (logical channels).
  wk: (KH,KW,Cin,CP) bf16, BN scale folded, Cout zero-padded to CP (mult of 128).
  shift: (1,CP) f32 (zero in padded channels).
  residual: optional (N,OH,OW,CP) bf16.
  Returns (N,OH,OW,CP) bf16; padded channels are exactly 0."""
  n, h, wd, cin = x.shape
  kh, kw, wcin, cp = wk.shape
  assert wcin == cin and cp % LANE == 0
  oh = (h + 2 * padding - dilation * (kh - 1) - 1) // stride + 1
  ow = (wd + 2 * padding - dilation * (kw - 1) - 1) // stride + 1
  k = kh * kw * cin
  m = n * oh * ow
  tile_m = _choose_tile_m(m)
  m_pad = _round_up(m, tile_m)

  xpad = jnp.pad(x.astype(_ACT_DTYPE),
                 ((0, 0), (padding, padding), (padding, padding), (0, 0)))
  slab = _im2col(xpad, kh, kw, stride, dilation, oh, ow)            # (m, k)
  slab = jnp.pad(slab, ((0, m_pad - m), (0, 0)))
  w2d = wk.reshape(k, cp)

  inputs = [slab, w2d, shift]
  in_specs = [
      pl.BlockSpec((tile_m, k), lambda i: (i, 0)),
      pl.BlockSpec((k, cp), lambda i: (0, 0)),
      pl.BlockSpec((1, cp), lambda i: (0, 0)),
  ]
  bytes_accessed = m_pad * k * 2 + k * cp * 2 + cp * 4 + m_pad * cp * 2
  if residual is not None:
    res = residual.reshape(-1, residual.shape[-1]).astype(_ACT_DTYPE)
    assert res.shape == (m, cp), (res.shape, m, cp)
    res = jnp.pad(res, ((0, m_pad - m), (0, 0)))
    inputs.append(res)
    in_specs.append(pl.BlockSpec((tile_m, cp), lambda i: (i, 0)))
    bytes_accessed += m_pad * cp * 2

  out = pl.pallas_call(
      _make_conv_kernel(relu, residual is not None),
      out_shape=jax.ShapeDtypeStruct((m_pad, cp), _ACT_DTYPE),
      grid_spec=pltpu.PrefetchScalarGridSpec(
          num_scalar_prefetch=0,
          grid=(m_pad // tile_m,),
          in_specs=in_specs,
          out_specs=pl.BlockSpec((tile_m, cp), lambda i: (i, 0)),
      ),
      compiler_params=pltpu.CompilerParams(
          dimension_semantics=("parallel",),
          vmem_limit_bytes=_VMEM_LIMIT),
      cost_estimate=pl.CostEstimate(
          flops=2 * m_pad * k * cp,
          transcendentals=0,
          bytes_accessed=bytes_accessed),
  )(*inputs)
  return out[:m].reshape(n, oh, ow, cp)


def maxpool2d(x, *, kernel_size=3, stride=2, padding=1):
  """x: (N,H,W,C) bf16 with C a multiple of 128. Returns (N,OH,OW,C) bf16."""
  n, h, wd, c = x.shape
  oh = (h + 2 * padding - kernel_size) // stride + 1
  ow = (wd + 2 * padding - kernel_size) // stride + 1
  m = n * oh * ow
  t = kernel_size * kernel_size
  tile_m = _choose_tile_m(m)
  m_pad = _round_up(m, tile_m)

  neg = float(jnp.finfo(x.dtype).min)
  xpad = jnp.pad(x, ((0, 0), (padding, padding), (padding, padding), (0, 0)),
                 constant_values=neg)
  taps = []
  for i in range(kernel_size):
    for j in range(kernel_size):
      sl = xpad[:, i:i + (oh - 1) * stride + 1:stride,
                j:j + (ow - 1) * stride + 1:stride, :]
      taps.append(sl.reshape(-1, c))
  taps = jnp.stack(taps, axis=0)                        # (t, m, c)
  taps = jnp.pad(taps, ((0, 0), (0, m_pad - m), (0, 0)))

  out = pl.pallas_call(
      _maxpool_kernel,
      out_shape=jax.ShapeDtypeStruct((m_pad, c), x.dtype),
      grid_spec=pltpu.PrefetchScalarGridSpec(
          num_scalar_prefetch=0,
          grid=(m_pad // tile_m,),
          in_specs=[pl.BlockSpec((t, tile_m, c), lambda i: (0, i, 0))],
          out_specs=pl.BlockSpec((tile_m, c), lambda i: (i, 0)),
      ),
      compiler_params=pltpu.CompilerParams(
          dimension_semantics=("parallel",),
          vmem_limit_bytes=_VMEM_LIMIT),
  )(taps)
  return out[:m].reshape(n, oh, ow, c)


def adaptive_avg_pool_1x1(x):
  n, h, wd, c = x.shape
  xf = x.reshape(n, h * wd, c)
  return pl.pallas_call(
      _avgpool_kernel,
      out_shape=jax.ShapeDtypeStruct((n, c), jnp.float32),
  )(xf)


# -------------------------- deterministic params ---------------------------

def _conv_init(key, kh, kw, cin, cout):
  fan_in = cin * kh * kw
  std = (2.0 / fan_in) ** 0.5
  return std * jax.random.normal(key, (kh, kw, cin, cout), dtype=jnp.float32)


def _bn_init(key, c, eps=1e-5):
  k1, k2, k3, k4 = jax.random.split(key, 4)
  gamma = 1.0 + 0.05 * jax.random.normal(k1, (c,), jnp.float32)
  beta = 0.05 * jax.random.normal(k2, (c,), jnp.float32)
  mean = 0.05 * jax.random.normal(k3, (c,), jnp.float32)
  var = 1.0 + 0.1 * jax.random.uniform(k4, (c,), jnp.float32)
  scale = gamma * jax.lax.rsqrt(var + eps)
  shift = beta - mean * scale
  return scale, shift


def _fold_conv_bn(w, scale, shift):
  """Fold BN scale into conv weights, pad Cout -> multiple of 128, cast bf16."""
  kh, kw, cin, cout = w.shape
  cp = _round_up(cout, LANE)
  wf = w.astype(jnp.float32) * scale.astype(jnp.float32).reshape(1, 1, 1, cout)
  wf = jnp.pad(wf, ((0, 0), (0, 0), (0, 0), (0, cp - cout)))
  sh = jnp.pad(shift.astype(jnp.float32), (0, cp - cout)).reshape(1, cp)
  return wf.astype(jnp.bfloat16), sh


def make_resnet_head_params(key, *, channels, in_planes, blocks_per_layer):
  def nk():
    nonlocal key
    key, sub = jax.random.split(key)
    return sub

  head_w = _conv_init(nk(), 7, 7, channels, in_planes)
  head_bn = _bn_init(nk(), in_planes)
  params = {"head": _fold_conv_bn(head_w, *head_bn), "layers": []}

  cur = in_planes
  for li in range(len(blocks_per_layer)):
    planes = in_planes * (2 ** li)           # planes = 2**(log2(in_planes)+li)
    layer_stride = 1 if li == 0 else 2
    blocks = []
    for bi in range(blocks_per_layer[li]):
      s = layer_stride if bi == 0 else 1
      w1 = _conv_init(nk(), 3, 3, cur, planes)
      b1 = _bn_init(nk(), planes)
      w2 = _conv_init(nk(), 3, 3, planes, planes)
      b2 = _bn_init(nk(), planes)
      blk = {"stride": s, "cin": cur, "cout": planes,
             "c1": _fold_conv_bn(w1, *b1),
             "c2": _fold_conv_bn(w2, *b2),
             "ds": None}
      # BasicBlock.EXPANSION == 1: downsample on first block if shape changes.
      if bi == 0 and (s != 1 or cur != planes):
        wd = _conv_init(nk(), 1, 1, cur, planes)
        bd = _bn_init(nk(), planes)
        blk["ds"] = _fold_conv_bn(wd, *bd)
      blocks.append(blk)
      cur = planes
    params["layers"].append(blocks)
  params["embedding_dim"] = cur
  return params


# ------------------------------- forward -----------------------------------

def resnet_head_forward(x_nchw, params):
  """x_nchw: (N, channels, H, W) float32 -> (N, embedding_dim) float32."""
  x = jnp.transpose(x_nchw, (0, 2, 3, 1)).astype(_ACT_DTYPE)  # NCHW -> NHWC

  # network_head: conv7x7/s2/p3 (no bias) + BN + ReLU + maxpool3/s2/p1
  hw, hshift = params["head"]
  x = conv2d_bn_act(x, hw, hshift, stride=2, padding=3, relu=True)
  x = maxpool2d(x, kernel_size=3, stride=2, padding=1)

  # network_body: 4 stages of BasicBlocks (channel axis stays padded to 128;
  # padded channels are identically zero throughout).
  for blocks in params["layers"]:
    for blk in blocks:
      s = blk["stride"]
      x_in = x[..., :blk["cin"]]            # slice logical channels for K
      if blk["ds"] is not None:
        dw, dshift = blk["ds"]
        identity = conv2d_bn_act(x_in, dw, dshift, stride=s, padding=0,
                                 relu=False)
      else:
        identity = x
      w1, s1 = blk["c1"]
      w2, s2 = blk["c2"]
      h = conv2d_bn_act(x_in, w1, s1, stride=s, padding=1, dilation=1,
                        relu=True)
      h_in = h[..., :blk["cout"]]
      # conv2 + BN + residual add + final ReLU fused in one kernel epilogue:
      # y = relu(identity + BN(conv2(h)))
      x = conv2d_bn_act(h_in, w2, s2, stride=1, padding=1, dilation=1,
                        relu=True, residual=identity)

  # adaptive_avg_pool((1,1)) then squeeze -> (N, C); drop channel padding.
  z = adaptive_avg_pool_1x1(x)
  return z[:, :params["embedding_dim"]]


# --------------------------------- main -------------------------------------

if __name__ == "__main__":
  # Small, module-consistent configuration (depth=18 -> BasicBlock, [2,2,2,2]).
  CHANNELS = 4
  IN_PLANES = 8
  BLOCKS_PER_LAYER = (2, 2, 2, 2)
  N, H, W = 2, 16, 16

  key = jax.random.PRNGKey(0)
  pkey, xkey = jax.random.split(key)
  params = make_resnet_head_params(pkey, channels=CHANNELS,
                                   in_planes=IN_PLANES,
                                   blocks_per_layer=BLOCKS_PER_LAYER)
  x = jax.random.normal(xkey, (N, CHANNELS, H, W), dtype=jnp.float32)

  # Close over params so block strides/shapes stay static under jit; the
  # entire network (all pallas_calls) compiles into one executable.
  fwd = jax.jit(lambda inp: resnet_head_forward(inp, params))

  z = fwd(x)
  z = jax.block_until_ready(z)

  expected_dim = IN_PLANES * (2 ** (len(BLOCKS_PER_LAYER) - 1))  # 64
  assert z.shape == (N, expected_dim), z.shape
  assert bool(jnp.all(jnp.isfinite(z)))
  print("KERNEL_OK")
</pallas_src>

<mosaic_0001>
module attributes {stable_mosaic.version = 11 : i64} {
  func.func @kernel(%arg0: i32, %arg1: memref<128x196xbf16, #tpu.memory_space<vmem>>, %arg2: memref<196x128xbf16, #tpu.memory_space<vmem>>, %arg3: memref<1x128xf32, #tpu.memory_space<vmem>>, %arg4: memref<128x128xbf16, #tpu.memory_space<vmem>>) attributes {dimension_semantics = [#tpu.dimension_semantics<parallel>], iteration_bounds = array<i64: 1>, scalar_prefetch = 0 : i64, scratch_operands = 0 : i64, tpu.core_type = #tpu.core_type<tc>, window_params = [{transform_indices = @transform_0, window_bounds = array<i64: 128, 196>}, {pipeline_mode = #tpu.pipeline_mode<synchronous>, transform_indices = @transform_1, window_bounds = array<i64: 196, 128>}, {pipeline_mode = #tpu.pipeline_mode<synchronous>, transform_indices = @transform_2, window_bounds = array<i64: 1, 128>}, {transform_indices = @transform_3, window_bounds = array<i64: 128, 128>}]} {
    %c0 = arith.constant 0 : index
    %c0_0 = arith.constant 0 : index
    %0 = vector.load %arg1[%c0, %c0_0] : memref<128x196xbf16, #tpu.memory_space<vmem>>, vector<128x196xbf16>
    %c0_1 = arith.constant 0 : index
    %c0_2 = arith.constant 0 : index
    %1 = vector.load %arg2[%c0_1, %c0_2] : memref<196x128xbf16, #tpu.memory_space<vmem>>, vector<196x128xbf16>
    %cst = arith.constant dense<0.000000e+00> : vector<128x128xf32>
    %2 = tpu.matmul %0, %1, %cst {dimension_numbers = #tpu.dot_dimension_numbers<[1], [0], [0], [1], [0, 0, 1, 1], [], []>} : vector<128x196xbf16>, vector<196x128xbf16>, vector<128x128xf32> -> vector<128x128xf32>
    %c0_3 = arith.constant 0 : index
    %c0_4 = arith.constant 0 : index
    %3 = vector.load %arg3[%c0_3, %c0_4] : memref<1x128xf32, #tpu.memory_space<vmem>>, vector<1x128xf32>
    %4 = vector.broadcast %3 : vector<1x128xf32> to vector<128x128xf32>
    %5 = arith.addf %2, %4 : vector<128x128xf32>
    %cst_5 = arith.constant 0.000000e+00 : f32
    %6 = vector.broadcast %cst_5 : f32 to vector<128x128xf32>
    %7 = arith.maximumf %5, %6 : vector<128x128xf32>
    %8 = arith.truncf %7 : vector<128x128xf32> to vector<128x128xbf16>
    %c0_6 = arith.constant 0 : index
    %c0_7 = arith.constant 0 : index
    %9 = vector.load %arg4[%c0_6, %c0_7] : memref<128x128xbf16, #tpu.memory_space<vmem>>, vector<128x128xbf16>
    tpu.vector_store %arg4[%c0_6, %c0_7], %8 {strides = array<i32>} : memref<128x128xbf16, #tpu.memory_space<vmem>>, vector<128x128xbf16>,
    return
  }
  func.func @transform_0(%arg0: i32) -> (i32, i32) {
    %c0_i32 = arith.constant 0 : i32
    %c0_i32_0 = arith.constant 0 : i32
    return %arg0, %c0_i32 : i32, i32
  }
  func.func @transform_1(%arg0: i32) -> (i32, i32) {
    %c0_i32 = arith.constant 0 : i32
    %c0_i32_0 = arith.constant 0 : i32
    %c0_i32_1 = arith.constant 0 : i32
    return %c0_i32, %c0_i32_0 : i32, i32
  }
  func.func @transform_2(%arg0: i32) -> (i32, i32) {
    %c0_i32 = arith.constant 0 : i32
    %c0_i32_0 = arith.constant 0 : i32
    %c0_i32_1 = arith.constant 0 : i32
    return %c0_i32, %c0_i32_0 : i32, i32
  }
  func.func @transform_3(%arg0: i32) -> (i32, i32) {
    %c0_i32 = arith.constant 0 : i32
    %c0_i32_0 = arith.constant 0 : i32
    return %arg0, %c0_i32 : i32, i32
  }
}

module attributes {stable_mosaic.version = 11 : i64} {
  func.func @_maxpool_kernel(%arg0: i32, %arg1: memref<9x32x128xbf16, #tpu.memory_space<vmem>>, %arg2: memref<32x128xbf16, #tpu.memory_space<vmem>>) attributes {dimension_semantics = [#tpu.dimension_semantics<parallel>], iteration_bounds = array<i64: 1>, scalar_prefetch = 0 : i64, scratch_operands = 0 : i64, tpu.core_type = #tpu.core_type<tc>, window_params = [{transform_indices = @transform_0, window_bounds = array<i64: 9, 32, 128>}, {transform_indices = @transform_1, window_bounds = array<i64: 32, 128>}]} {
    %c0 = arith.constant 0 : index
    %c0_0 = arith.constant 0 : index
    %c0_1 = arith.constant 0 : index
    %0 = vector.load %arg1[%c0, %c0_0, %c0_1] : memref<9x32x128xbf16, #tpu.memory_space<vmem>>, vector<9x32x128xbf16>
    %cst = arith.constant dense<0xFF80> : vector<32x128xbf16>
    %1 = vector.multi_reduction <maximumf>, %0, %cst [0] : vector<9x32x128xbf16> to vector<32x128xbf16>
    %c0_2 = arith.constant 0 : index
    %c0_3 = arith.constant 0 : index
    %2 = vector.load %arg2[%c0_2, %c0_3] : memref<32x128xbf16, #tpu.memory_space<vmem>>, vector<32x128xbf16>
    tpu.vector_store %arg2[%c0_2, %c0_3], %1 {strides = array<i32>} : memref<32x128xbf16, #tpu.memory_space<vmem>>, vector<32x128xbf16>,
    return
  }
  func.func @transform_0(%arg0: i32) -> (i32, i32, i32) {
    %c0_i32 = arith.constant 0 : i32
    %c0_i32_0 = arith.constant 0 : i32
    %c0_i32_1 = arith.constant 0 : i32
    return %c0_i32, %arg0, %c0_i32_0 : i32, i32, i32
  }
  func.func @transform_1(%arg0: i32) -> (i32, i32) {
    %c0_i32 = arith.constant 0 : i32
    %c0_i32_0 = arith.constant 0 : i32
    return %arg0, %c0_i32 : i32, i32
  }
}

module attributes {stable_mosaic.version = 11 : i64} {
  func.func @kernel(%arg0: i32, %arg1: memref<32x72xbf16, #tpu.memory_space<vmem>>, %arg2: memref<72x128xbf16, #tpu.memory_space<vmem>>, %arg3: memref<1x128xf32, #tpu.memory_space<vmem>>, %arg4: memref<32x128xbf16, #tpu.memory_space<vmem>>) attributes {dimension_semantics = [#tpu.dimension_semantics<parallel>], iteration_bounds = array<i64: 1>, scalar_prefetch = 0 : i64, scratch_operands = 0 : i64, tpu.core_type = #tpu.core_type<tc>, window_params = [{transform_indices = @transform_0, window_bounds = array<i64: 32, 72>}, {pipeline_mode = #tpu.pipeline_mode<synchronous>, transform_indices = @transform_1, window_bounds = array<i64: 72, 128>}, {pipeline_mode = #tpu.pipeline_mode<synchronous>, transform_indices = @transform_2, window_bounds = array<i64: 1, 128>}, {transform_indices = @transform_3, window_bounds = array<i64: 32, 128>}]} {
    %c0 = arith.constant 0 : index
    %c0_0 = arith.constant 0 : index
    %0 = vector.load %arg1[%c0, %c0_0] : memref<32x72xbf16, #tpu.memory_space<vmem>>, vector<32x72xbf16>
    %c0_1 = arith.constant 0 : index
    %c0_2 = arith.constant 0 : index
    %1 = vector.load %arg2[%c0_1, %c0_2] : memref<72x128xbf16, #tpu.memory_space<vmem>>, vector<72x128xbf16>
    %cst = arith.constant dense<0.000000e+00> : vector<32x128xf32>
    %2 = tpu.matmul %0, %1, %cst {dimension_numbers = #tpu.dot_dimension_numbers<[1], [0], [0], [1], [0, 0, 1, 1], [], []>} : vector<32x72xbf16>, vector<72x128xbf16>, vector<32x128xf32> -> vector<32x128xf32>
    %c0_3 = arith.constant 0 : index
    %c0_4 = arith.constant 0 : index
    %3 = vector.load %arg3[%c0_3, %c0_4] : memref<1x128xf32, #tpu.memory_space<vmem>>, vector<1x128xf32>
    %4 = vector.broadcast %3 : vector<1x128xf32> to vector<32x128xf32>
    %5 = arith.addf %2, %4 : vector<32x128xf32>
    %cst_5 = arith.constant 0.000000e+00 : f32
    %6 = vector.broadcast %cst_5 : f32 to vector<32x128xf32>
    %7 = arith.maximumf %5, %6 : vector<32x128xf32>
    %8 = arith.truncf %7 : vector<32x128xf32> to vector<32x128xbf16>
    %c0_6 = arith.constant 0 : index
    %c0_7 = arith.constant 0 : index
    %9 = vector.load %arg4[%c0_6, %c0_7] : memref<32x128xbf16, #tpu.memory_space<vmem>>, vector<32x128xbf16>
    tpu.vector_store %arg4[%c0_6, %c0_7], %8 {strides = array<i32>} : memref<32x128xbf16, #tpu.memory_space<vmem>>, vector<32x128xbf16>,
    return
  }
  func.func @transform_0(%arg0: i32) -> (i32, i32) {
    %c0_i32 = arith.constant 0 : i32
    %c0_i32_0 = arith.constant 0 : i32
    return %arg0, %c0_i32 : i32, i32
  }
  func.func @transform_1(%arg0: i32) -> (i32, i32) {
    %c0_i32 = arith.constant 0 : i32
    %c0_i32_0 = arith.constant 0 : i32
    %c0_i32_1 = arith.constant 0 : i32
    return %c0_i32, %c0_i32_0 : i32, i32
  }
  func.func @transform_2(%arg0: i32) -> (i32, i32) {
    %c0_i32 = arith.constant 0 : i32
    %c0_i32_0 = arith.constant 0 : i32
    %c0_i32_1 = arith.constant 0 : i32
    return %c0_i32, %c0_i32_0 : i32, i32
  }
  func.func @transform_3(%arg0: i32) -> (i32, i32) {
    %c0_i32 = arith.constant 0 : i32
    %c0_i32_0 = arith.constant 0 : i32
    return %arg0, %c0_i32 : i32, i32
  }
}

module attributes {stable_mosaic.version = 11 : i64} {
  func.func @kernel(%arg0: i32, %arg1: memref<32x72xbf16, #tpu.memory_space<vmem>>, %arg2: memref<72x128xbf16, #tpu.memory_space<vmem>>, %arg3: memref<1x128xf32, #tpu.memory_space<vmem>>, %arg4: memref<32x128xbf16, #tpu.memory_space<vmem>>, %arg5: memref<32x128xbf16, #tpu.memory_space<vmem>>) attributes {dimension_semantics = [#tpu.dimension_semantics<parallel>], iteration_bounds = array<i64: 1>, scalar_prefetch = 0 : i64, scratch_operands = 0 : i64, tpu.core_type = #tpu.core_type<tc>, window_params = [{transform_indices = @transform_0, window_bounds = array<i64: 32, 72>}, {pipeline_mode = #tpu.pipeline_mode<synchronous>, transform_indices = @transform_1, window_bounds = array<i64: 72, 128>}, {pipeline_mode = #tpu.pipeline_mode<synchronous>, transform_indices = @transform_2, window_bounds = array<i64: 1, 128>}, {transform_indices = @transform_3, window_bounds = array<i64: 32, 128>}, {transform_indices = @transform_4, window_bounds = array<i64: 32, 128>}]} {
    %c0 = arith.constant 0 : index
    %c0_0 = arith.constant 0 : index
    %0 = vector.load %arg1[%c0, %c0_0] : memref<32x72xbf16, #tpu.memory_space<vmem>>, vector<32x72xbf16>
    %c0_1 = arith.constant 0 : index
    %c0_2 = arith.constant 0 : index
    %1 = vector.load %arg2[%c0_1, %c0_2] : memref<72x128xbf16, #tpu.memory_space<vmem>>, vector<72x128xbf16>
    %cst = arith.constant dense<0.000000e+00> : vector<32x128xf32>
    %2 = tpu.matmul %0, %1, %cst {dimension_numbers = #tpu.dot_dimension_numbers<[1], [0], [0], [1], [0, 0, 1, 1], [], []>} : vector<32x72xbf16>, vector<72x128xbf16>, vector<32x128xf32> -> vector<32x128xf32>
    %c0_3 = arith.constant 0 : index
    %c0_4 = arith.constant 0 : index
    %3 = vector.load %arg3[%c0_3, %c0_4] : memref<1x128xf32, #tpu.memory_space<vmem>>, vector<1x128xf32>
    %4 = vector.broadcast %3 : vector<1x128xf32> to vector<32x128xf32>
    %5 = arith.addf %2, %4 : vector<32x128xf32>
    %c0_5 = arith.constant 0 : index
    %c0_6 = arith.constant 0 : index
    %6 = vector.load %arg4[%c0_5, %c0_6] : memref<32x128xbf16, #tpu.memory_space<vmem>>, vector<32x128xbf16>
    %7 = arith.extf %6 : vector<32x128xbf16> to vector<32x128xf32>
    %8 = arith.addf %5, %7 : vector<32x128xf32>
    %cst_7 = arith.constant 0.000000e+00 : f32
    %9 = vector.broadcast %cst_7 : f32 to vector<32x128xf32>
    %10 = arith.maximumf %8, %9 : vector<32x128xf32>
    %11 = arith.truncf %10 : vector<32x128xf32> to vector<32x128xbf16>
    %c0_8 = arith.constant 0 : index
    %c0_9 = arith.constant 0 : index
    %12 = vector.load %arg5[%c0_8, %c0_9] : memref<32x128xbf16, #tpu.memory_space<vmem>>, vector<32x128xbf16>
    tpu.vector_store %arg5[%c0_8, %c0_9], %11 {strides = array<i32>} : memref<32x128xbf16, #tpu.memory_space<vmem>>, vector<32x128xbf16>,
    return
  }
  func.func @transform_0(%arg0: i32) -> (i32, i32) {
    %c0_i32 = arith.constant 0 : i32
    %c0_i32_0 = arith.constant 0 : i32
    return %arg0, %c0_i32 : i32, i32
  }
  func.func @transform_1(%arg0: i32) -> (i32, i32) {
    %c0_i32 = arith.constant 0 : i32
    %c0_i32_0 = arith.constant 0 : i32
    %c0_i32_1 = arith.constant 0 : i32
    return %c0_i32, %c0_i32_0 : i32, i32
  }
  func.func @transform_2(%arg0: i32) -> (i32, i32) {
    %c0_i32 = arith.constant 0 : i32
    %c0_i32_0 = arith.constant 0 : i32
    %c0_i32_1 = arith.constant 0 : i32
    return %c0_i32, %c0_i32_0 : i32, i32
  }
  func.func @transform_3(%arg0: i32) -> (i32, i32) {
    %c0_i32 = arith.constant 0 : i32
    %c0_i32_0 = arith.constant 0 : i32
    return %arg0, %c0_i32 : i32, i32
  }
  func.func @transform_4(%arg0: i32) -> (i32, i32) {
    %c0_i32 = arith.constant 0 : i32
    %c0_i32_0 = arith.constant 0 : i32
    return %arg0, %c0_i32 : i32, i32
  }
}

module attributes {stable_mosaic.version = 11 : i64} {
  func.func @kernel(%arg0: i32, %arg1: memref<8x72xbf16, #tpu.memory_space<vmem>>, %arg2: memref<72x128xbf16, #tpu.memory_space<vmem>>, %arg3: memref<1x128xf32, #tpu.memory_space<vmem>>, %arg4: memref<8x128xbf16, #tpu.memory_space<vmem>>) attributes {dimension_semantics = [#tpu.dimension_semantics<parallel>], iteration_bounds = array<i64: 1>, scalar_prefetch = 0 : i64, scratch_operands = 0 : i64, tpu.core_type = #tpu.core_type<tc>, window_params = [{transform_indices = @transform_0, window_bounds = array<i64: 8, 72>}, {pipeline_mode = #tpu.pipeline_mode<synchronous>, transform_indices = @transform_1, window_bounds = array<i64: 72, 128>}, {pipeline_mode = #tpu.pipeline_mode<synchronous>, transform_indices = @transform_2, window_bounds = array<i64: 1, 128>}, {transform_indices = @transform_3, window_bounds = array<i64: 8, 128>}]} {
    %c0 = arith.constant 0 : index
    %c0_0 = arith.constant 0 : index
    %0 = vector.load %arg1[%c0, %c0_0] : memref<8x72xbf16, #tpu.memory_space<vmem>>, vector<8x72xbf16>
    %c0_1 = arith.constant 0 : index
    %c0_2 = arith.constant 0 : index
    %1 = vector.load %arg2[%c0_1, %c0_2] : memref<72x128xbf16, #tpu.memory_space<vmem>>, vector<72x128xbf16>
    %cst = arith.constant dense<0.000000e+00> : vector<8x128xf32>
    %2 = tpu.matmul %0, %1, %cst {dimension_numbers = #tpu.dot_dimension_numbers<[1], [0], [0], [1], [0, 0, 1, 1], [], []>} : vector<8x72xbf16>, vector<72x128xbf16>, vector<8x128xf32> -> vector<8x128xf32>
    %c0_3 = arith.constant 0 : index
    %c0_4 = arith.constant 0 : index
    %3 = vector.load %arg3[%c0_3, %c0_4] : memref<1x128xf32, #tpu.memory_space<vmem>>, vector<1x128xf32>
    %4 = vector.broadcast %3 : vector<1x128xf32> to vector<8x128xf32>
    %5 = arith.addf %2, %4 : vector<8x128xf32>
    %cst_5 = arith.constant 0.000000e+00 : f32
    %6 = vector.broadcast %cst_5 : f32 to vector<8x128xf32>
    %7 = arith.maximumf %5, %6 : vector<8x128xf32>
    %8 = arith.truncf %7 : vector<8x128xf32> to vector<8x128xbf16>
    %c0_6 = arith.constant 0 : index
    %c0_7 = arith.constant 0 : index
    %9 = vector.load %arg4[%c0_6, %c0_7] : memref<8x128xbf16, #tpu.memory_space<vmem>>, vector<8x128xbf16>
    tpu.vector_store %arg4[%c0_6, %c0_7], %8 {strides = array<i32>} : memref<8x128xbf16, #tpu.memory_space<vmem>>, vector<8x128xbf16>,
    return
  }
  func.func @transform_0(%arg0: i32) -> (i32, i32) {
    %c0_i32 = arith.constant 0 : i32
    %c0_i32_0 = arith.constant 0 : i32
    return %arg0, %c0_i32 : i32, i32
  }
  func.func @transform_1(%arg0: i32) -> (i32, i32) {
    %c0_i32 = arith.constant 0 : i32
    %c0_i32_0 = arith.constant 0 : i32
    %c0_i32_1 = arith.constant 0 : i32
    return %c0_i32, %c0_i32_0 : i32, i32
  }
  func.func @transform_2(%arg0: i32) -> (i32, i32) {
    %c0_i32 = arith.constant 0 : i32
    %c0_i32_0 = arith.constant 0 : i32
    %c0_i32_1 = arith.constant 0 : i32
    return %c0_i32, %c0_i32_0 : i32, i32
  }
  func.func @transform_3(%arg0: i32) -> (i32, i32) {
    %c0_i32 = arith.constant 0 : i32
    %c0_i32_0 = arith.constant 0 : i32
    return %arg0, %c0_i32 : i32, i32
  }
}

module attributes {stable_mosaic.version = 11 : i64} {
  func.func @kernel(%arg0: i32, %arg1: memref<8x144xbf16, #tpu.memory_space<vmem>>, %arg2: memref<144x128xbf16, #tpu.memory_space<vmem>>, %arg3: memref<1x128xf32, #tpu.memory_space<vmem>>, %arg4: memref<8x128xbf16, #tpu.memory_space<vmem>>) attributes {dimension_semantics = [#tpu.dimension_semantics<parallel>], iteration_bounds = array<i64: 1>, scalar_prefetch = 0 : i64, scratch_operands = 0 : i64, tpu.core_type = #tpu.core_type<tc>, window_params = [{transform_indices = @transform_0, window_bounds = array<i64: 8, 144>}, {pipeline_mode = #tpu.pipeline_mode<synchronous>, transform_indices = @transform_1, window_bounds = array<i64: 144, 128>}, {pipeline_mode = #tpu.pipeline_mode<synchronous>, transform_indices = @transform_2, window_bounds = array<i64: 1, 128>}, {transform_indices = @transform_3, window_bounds = array<i64: 8, 128>}]} {
    %c0 = arith.constant 0 : index
    %c0_0 = arith.constant 0 : index
    %0 = vector.load %arg1[%c0, %c0_0] : memref<8x144xbf16, #tpu.memory_space<vmem>>, vector<8x144xbf16>
    %c0_1 = arith.constant 0 : index
    %c0_2 = arith.constant 0 : index
    %1 = vector.load %arg2[%c0_1, %c0_2] : memref<144x128xbf16, #tpu.memory_space<vmem>>, vector<144x128xbf16>
    %cst = arith.constant dense<0.000000e+00> : vector<8x128xf32>
    %2 = tpu.matmul %0, %1, %cst {dimension_numbers = #tpu.dot_dimension_numbers<[1], [0], [0], [1], [0, 0, 1, 1], [], []>} : vector<8x144xbf16>, vector<144x128xbf16>, vector<8x128xf32> -> vector<8x128xf32>
    %c0_3 = arith.constant 0 : index
    %c0_4 = arith.constant 0 : index
    %3 = vector.load %arg3[%c0_3, %c0_4] : memref<1x128xf32, #tpu.memory_space<vmem>>, vector<1x128xf32>
    %4 = vector.broadcast %3 : vector<1x128xf32> to vector<8x128xf32>
    %5 = arith.addf %2, %4 : vector<8x128xf32>
    %cst_5 = arith.constant 0.000000e+00 : f32
    %6 = vector.broadcast %cst_5 : f32 to vector<8x128xf32>
    %7 = arith.maximumf %5, %6 : vector<8x128xf32>
    %8 = arith.truncf %7 : vector<8x128xf32> to vector<8x128xbf16>
    %c0_6 = arith.constant 0 : index
    %c0_7 = arith.constant 0 : index
    %9 = vector.load %arg4[%c0_6, %c0_7] : memref<8x128xbf16, #tpu.memory_space<vmem>>, vector<8x128xbf16>
    tpu.vector_store %arg4[%c0_6, %c0_7], %8 {strides = array<i32>} : memref<8x128xbf16, #tpu.memory_space<vmem>>, vector<8x128xbf16>,
    return
  }
  func.func @transform_0(%arg0: i32) -> (i32, i32) {
    %c0_i32 = arith.constant 0 : i32
    %c0_i32_0 = arith.constant 0 : i32
    return %arg0, %c0_i32 : i32, i32
  }
  func.func @transform_1(%arg0: i32) -> (i32, i32) {
    %c0_i32 = arith.constant 0 : i32
    %c0_i32_0 = arith.constant 0 : i32
    %c0_i32_1 = arith.constant 0 : i32
    return %c0_i32, %c0_i32_0 : i32, i32
  }
  func.func @transform_2(%arg0: i32) -> (i32, i32) {
    %c0_i32 = arith.constant 0 : i32
    %c0_i32_0 = arith.constant 0 : i32
    %c0_i32_1 = arith.constant 0 : i32
    return %c0_i32, %c0_i32_0 : i32, i32
  }
  func.func @transform_3(%arg0: i32) -> (i32, i32) {
    %c0_i32 = arith.constant 0 : i32
    %c0_i32_0 = arith.constant 0 : i32
    return %arg0, %c0_i32 : i32, i32
  }
}

module attributes {stable_mosaic.version = 11 : i64} {
  func.func @kernel(%arg0: i32, %arg1: memref<8x144xbf16, #tpu.memory_space<vmem>>, %arg2: memref<144x128xbf16, #tpu.memory_space<vmem>>, %arg3: memref<1x128xf32, #tpu.memory_space<vmem>>, %arg4: memref<8x128xbf16, #tpu.memory_space<vmem>>, %arg5: memref<8x128xbf16, #tpu.memory_space<vmem>>) attributes {dimension_semantics = [#tpu.dimension_semantics<parallel>], iteration_bounds = array<i64: 1>, scalar_prefetch = 0 : i64, scratch_operands = 0 : i64, tpu.core_type = #tpu.core_type<tc>, window_params = [{transform_indices = @transform_0, window_bounds = array<i64: 8, 144>}, {pipeline_mode = #tpu.pipeline_mode<synchronous>, transform_indices = @transform_1, window_bounds = array<i64: 144, 128>}, {pipeline_mode = #tpu.pipeline_mode<synchronous>, transform_indices = @transform_2, window_bounds = array<i64: 1, 128>}, {transform_indices = @transform_3, window_bounds = array<i64: 8, 128>}, {transform_indices = @transform_4, window_bounds = array<i64: 8, 128>}]} {
    %c0 = arith.constant 0 : index
    %c0_0 = arith.constant 0 : index
    %0 = vector.load %arg1[%c0, %c0_0] : memref<8x144xbf16, #tpu.memory_space<vmem>>, vector<8x144xbf16>
    %c0_1 = arith.constant 0 : index
    %c0_2 = arith.constant 0 : index
    %1 = vector.load %arg2[%c0_1, %c0_2] : memref<144x128xbf16, #tpu.memory_space<vmem>>, vector<144x128xbf16>
    %cst = arith.constant dense<0.000000e+00> : vector<8x128xf32>
    %2 = tpu.matmul %0, %1, %cst {dimension_numbers = #tpu.dot_dimension_numbers<[1], [0], [0], [1], [0, 0, 1, 1], [], []>} : vector<8x144xbf16>, vector<144x128xbf16>, vector<8x128xf32> -> vector<8x128xf32>
    %c0_3 = arith.constant 0 : index
    %c0_4 = arith.constant 0 : index
    %3 = vector.load %arg3[%c0_3, %c0_4] : memref<1x128xf32, #tpu.memory_space<vmem>>, vector<1x128xf32>
    %4 = vector.broadcast %3 : vector<1x128xf32> to vector<8x128xf32>
    %5 = arith.addf %2, %4 : vector<8x128xf32>
    %c0_5 = arith.constant 0 : index
    %c0_6 = arith.constant 0 : index
    %6 = vector.load %arg4[%c0_5, %c0_6] : memref<8x128xbf16, #tpu.memory_space<vmem>>, vector<8x128xbf16>
    %7 = arith.extf %6 : vector<8x128xbf16> to vector<8x128xf32>
    %8 = arith.addf %5, %7 : vector<8x128xf32>
    %cst_7 = arith.constant 0.000000e+00 : f32
    %9 = vector.broadcast %cst_7 : f32 to vector<8x128xf32>
    %10 = arith.maximumf %8, %9 : vector<8x128xf32>
    %11 = arith.truncf %10 : vector<8x128xf32> to vector<8x128xbf16>
    %c0_8 = arith.constant 0 : index
    %c0_9 = arith.constant 0 : index
    %12 = vector.load %arg5[%c0_8, %c0_9] : memref<8x128xbf16, #tpu.memory_space<vmem>>, vector<8x128xbf16>
    tpu.vector_store %arg5[%c0_8, %c0_9], %11 {strides = array<i32>} : memref<8x128xbf16, #tpu.memory_space<vmem>>, vector<8x128xbf16>,
    return
  }
  func.func @transform_0(%arg0: i32) -> (i32, i32) {
    %c0_i32 = arith.constant 0 : i32
    %c0_i32_0 = arith.constant 0 : i32
    return %arg0, %c0_i32 : i32, i32
  }
  func.func @transform_1(%arg0: i32) -> (i32, i32) {
    %c0_i32 = arith.constant 0 : i32
    %c0_i32_0 = arith.constant 0 : i32
    %c0_i32_1 = arith.constant 0 : i32
    return %c0_i32, %c0_i32_0 : i32, i32
  }
  func.func @transform_2(%arg0: i32) -> (i32, i32) {
    %c0_i32 = arith.constant 0 : i32
    %c0_i32_0 = arith.constant 0 : i32
    %c0_i32_1 = arith.constant 0 : i32
    return %c0_i32, %c0_i32_0 : i32, i32
  }
  func.func @transform_3(%arg0: i32) -> (i32, i32) {
    %c0_i32 = arith.constant 0 : i32
    %c0_i32_0 = arith.constant 0 : i32
    return %arg0, %c0_i32 : i32, i32
  }
  func.func @transform_4(%arg0: i32) -> (i32, i32) {
    %c0_i32 = arith.constant 0 : i32
    %c0_i32_0 = arith.constant 0 : i32
    return %arg0, %c0_i32 : i32, i32
  }
}

module attributes {stable_mosaic.version = 11 : i64} {
  func.func @kernel(%arg0: i32, %arg1: memref<8x8xbf16, #tpu.memory_space<vmem>>, %arg2: memref<8x128xbf16, #tpu.memory_space<vmem>>, %arg3: memref<1x128xf32, #tpu.memory_space<vmem>>, %arg4: memref<8x128xbf16, #tpu.memory_space<vmem>>) attributes {dimension_semantics = [#tpu.dimension_semantics<parallel>], iteration_bounds = array<i64: 1>, scalar_prefetch = 0 : i64, scratch_operands = 0 : i64, tpu.core_type = #tpu.core_type<tc>, window_params = [{transform_indices = @transform_0, window_bounds = array<i64: 8, 8>}, {pipeline_mode = #tpu.pipeline_mode<synchronous>, transform_indices = @transform_1, window_bounds = array<i64: 8, 128>}, {pipeline_mode = #tpu.pipeline_mode<synchronous>, transform_indices = @transform_2, window_bounds = array<i64: 1, 128>}, {transform_indices = @transform_3, window_bounds = array<i64: 8, 128>}]} {
    %c0 = arith.constant 0 : index
    %c0_0 = arith.constant 0 : index
    %0 = vector.load %arg1[%c0, %c0_0] : memref<8x8xbf16, #tpu.memory_space<vmem>>, vector<8x8xbf16>
    %c0_1 = arith.constant 0 : index
    %c0_2 = arith.constant 0 : index
    %1 = vector.load %arg2[%c0_1, %c0_2] : memref<8x128xbf16, #tpu.memory_space<vmem>>, vector<8x128xbf16>
    %cst = arith.constant dense<0.000000e+00> : vector<8x128xf32>
    %2 = tpu.matmul %0, %1, %cst {dimension_numbers = #tpu.dot_dimension_numbers<[1], [0], [0], [1], [0, 0, 1, 1], [], []>} : vector<8x8xbf16>, vector<8x128xbf16>, vector<8x128xf32> -> vector<8x128xf32>
    %c0_3 = arith.constant 0 : index
    %c0_4 = arith.constant 0 : index
    %3 = vector.load %arg3[%c0_3, %c0_4] : memref<1x128xf32, #tpu.memory_space<vmem>>, vector<1x128xf32>
    %4 = vector.broadcast %3 : vector<1x128xf32> to vector<8x128xf32>
    %5 = arith.addf %2, %4 : vector<8x128xf32>
    %6 = arith.truncf %5 : vector<8x128xf32> to vector<8x128xbf16>
    %c0_5 = arith.constant 0 : index
    %c0_6 = arith.constant 0 : index
    %7 = vector.load %arg4[%c0_5, %c0_6] : memref<8x128xbf16, #tpu.memory_space<vmem>>, vector<8x128xbf16>
    tpu.vector_store %arg4[%c0_5, %c0_6], %6 {strides = array<i32>} : memref<8x128xbf16, #tpu.memory_space<vmem>>, vector<8x128xbf16>,
    return
  }
  func.func @transform_0(%arg0: i32) -> (i32, i32) {
    %c0_i32 = arith.constant 0 : i32
    %c0_i32_0 = arith.constant 0 : i32
    return %arg0, %c0_i32 : i32, i32
  }
  func.func @transform_1(%arg0: i32) -> (i32, i32) {
    %c0_i32 = arith.constant 0 : i32
    %c0_i32_0 = arith.constant 0 : i32
    %c0_i32_1 = arith.constant 0 : i32
    return %c0_i32, %c0_i32_0 : i32, i32
  }
  func.func @transform_2(%arg0: i32) -> (i32, i32) {
    %c0_i32 = arith.constant 0 : i32
    %c0_i32_0 = arith.constant 0 : i32
    %c0_i32_1 = arith.constant 0 : i32
    return %c0_i32, %c0_i32_0 : i32, i32
  }
  func.func @transform_3(%arg0: i32) -> (i32, i32) {
    %c0_i32 = arith.constant 0 : i32
    %c0_i32_0 = arith.constant 0 : i32
    return %arg0, %c0_i32 : i32, i32
  }
}

module attributes {stable_mosaic.version = 11 : i64} {
  func.func @kernel(%arg0: i32, %arg1: memref<8x16xbf16, #tpu.memory_space<vmem>>, %arg2: memref<16x128xbf16, #tpu.memory_space<vmem>>, %arg3: memref<1x128xf32, #tpu.memory_space<vmem>>, %arg4: memref<8x128xbf16, #tpu.memory_space<vmem>>) attributes {dimension_semantics = [#tpu.dimension_semantics<parallel>], iteration_bounds = array<i64: 1>, scalar_prefetch = 0 : i64, scratch_operands = 0 : i64, tpu.core_type = #tpu.core_type<tc>, window_params = [{transform_indices = @transform_0, window_bounds = array<i64: 8, 16>}, {pipeline_mode = #tpu.pipeline_mode<synchronous>, transform_indices = @transform_1, window_bounds = array<i64: 16, 128>}, {pipeline_mode = #tpu.pipeline_mode<synchronous>, transform_indices = @transform_2, window_bounds = array<i64: 1, 128>}, {transform_indices = @transform_3, window_bounds = array<i64: 8, 128>}]} {
    %c0 = arith.constant 0 : index
    %c0_0 = arith.constant 0 : index
    %0 = vector.load %arg1[%c0, %c0_0] : memref<8x16xbf16, #tpu.memory_space<vmem>>, vector<8x16xbf16>
    %c0_1 = arith.constant 0 : index
    %c0_2 = arith.constant 0 : index
    %1 = vector.load %arg2[%c0_1, %c0_2] : memref<16x128xbf16, #tpu.memory_space<vmem>>, vector<16x128xbf16>
    %cst = arith.constant dense<0.000000e+00> : vector<8x128xf32>
    %2 = tpu.matmul %0, %1, %cst {dimension_numbers = #tpu.dot_dimension_numbers<[1], [0], [0], [1], [0, 0, 1, 1], [], []>} : vector<8x16xbf16>, vector<16x128xbf16>, vector<8x128xf32> -> vector<8x128xf32>
    %c0_3 = arith.constant 0 : index
    %c0_4 = arith.constant 0 : index
    %3 = vector.load %arg3[%c0_3, %c0_4] : memref<1x128xf32, #tpu.memory_space<vmem>>, vector<1x128xf32>
    %4 = vector.broadcast %3 : vector<1x128xf32> to vector<8x128xf32>
    %5 = arith.addf %2, %4 : vector<8x128xf32>
    %6 = arith.truncf %5 : vector<8x128xf32> to vector<8x128xbf16>
    %c0_5 = arith.constant 0 : index
    %c0_6 = arith.constant 0 : index
    %7 = vector.load %arg4[%c0_5, %c0_6] : memref<8x128xbf16, #tpu.memory_space<vmem>>, vector<8x128xbf16>
    tpu.vector_store %arg4[%c0_5, %c0_6], %6 {strides = array<i32>} : memref<8x128xbf16, #tpu.memory_space<vmem>>, vector<8x128xbf16>,
    return
  }
  func.func @transform_0(%arg0: i32) -> (i32, i32) {
    %c0_i32 = arith.constant 0 : i32
    %c0_i32_0 = arith.constant 0 : i32
    return %arg0, %c0_i32 : i32, i32
  }
  func.func @transform_1(%arg0: i32) -> (i32, i32) {
    %c0_i32 = arith.constant 0 : i32
    %c0_i32_0 = arith.constant 0 : i32
    %c0_i32_1 = arith.constant 0 : i32
    return %c0_i32, %c0_i32_0 : i32, i32
  }
  func.func @transform_2(%arg0: i32) -> (i32, i32) {
    %c0_i32 = arith.constant 0 : i32
    %c0_i32_0 = arith.constant 0 : i32
    %c0_i32_1 = arith.constant 0 : i32
    return %c0_i32, %c0_i32_0 : i32, i32
  }
  func.func @transform_3(%arg0: i32) -> (i32, i32) {
    %c0_i32 = arith.constant 0 : i32
    %c0_i32_0 = arith.constant 0 : i32
    return %arg0, %c0_i32 : i32, i32
  }
}

module attributes {stable_mosaic.version = 11 : i64} {
  func.func @kernel(%arg0: i32, %arg1: memref<8x288xbf16, #tpu.memory_space<vmem>>, %arg2: memref<288x128xbf16, #tpu.memory_space<vmem>>, %arg3: memref<1x128xf32, #tpu.memory_space<vmem>>, %arg4: memref<8x128xbf16, #tpu.memory_space<vmem>>, %arg5: memref<8x128xbf16, #tpu.memory_space<vmem>>) attributes {dimension_semantics = [#tpu.dimension_semantics<parallel>], iteration_bounds = array<i64: 1>, scalar_prefetch = 0 : i64, scratch_operands = 0 : i64, tpu.core_type = #tpu.core_type<tc>, window_params = [{transform_indices = @transform_0, window_bounds = array<i64: 8, 288>}, {pipeline_mode = #tpu.pipeline_mode<synchronous>, transform_indices = @transform_1, window_bounds = array<i64: 288, 128>}, {pipeline_mode = #tpu.pipeline_mode<synchronous>, transform_indices = @transform_2, window_bounds = array<i64: 1, 128>}, {transform_indices = @transform_3, window_bounds = array<i64: 8, 128>}, {transform_indices = @transform_4, window_bounds = array<i64: 8, 128>}]} {
    %c0 = arith.constant 0 : index
    %c0_0 = arith.constant 0 : index
    %0 = vector.load %arg1[%c0, %c0_0] : memref<8x288xbf16, #tpu.memory_space<vmem>>, vector<8x288xbf16>
    %c0_1 = arith.constant 0 : index
    %c0_2 = arith.constant 0 : index
    %1 = vector.load %arg2[%c0_1, %c0_2] : memref<288x128xbf16, #tpu.memory_space<vmem>>, vector<288x128xbf16>
    %cst = arith.constant dense<0.000000e+00> : vector<8x128xf32>
    %2 = tpu.matmul %0, %1, %cst {dimension_numbers = #tpu.dot_dimension_numbers<[1], [0], [0], [1], [0, 0, 1, 1], [], []>} : vector<8x288xbf16>, vector<288x128xbf16>, vector<8x128xf32> -> vector<8x128xf32>
    %c0_3 = arith.constant 0 : index
    %c0_4 = arith.constant 0 : index
    %3 = vector.load %arg3[%c0_3, %c0_4] : memref<1x128xf32, #tpu.memory_space<vmem>>, vector<1x128xf32>
    %4 = vector.broadcast %3 : vector<1x128xf32> to vector<8x128xf32>
    %5 = arith.addf %2, %4 : vector<8x128xf32>
    %c0_5 = arith.constant 0 : index
    %c0_6 = arith.constant 0 : index
    %6 = vector.load %arg4[%c0_5, %c0_6] : memref<8x128xbf16, #tpu.memory_space<vmem>>, vector<8x128xbf16>
    %7 = arith.extf %6 : vector<8x128xbf16> to vector<8x128xf32>
    %8 = arith.addf %5, %7 : vector<8x128xf32>
    %cst_7 = arith.constant 0.000000e+00 : f32
    %9 = vector.broadcast %cst_7 : f32 to vector<8x128xf32>
    %10 = arith.maximumf %8, %9 : vector<8x128xf32>
    %11 = arith.truncf %10 : vector<8x128xf32> to vector<8x128xbf16>
    %c0_8 = arith.constant 0 : index
    %c0_9 = arith.constant 0 : index
    %12 = vector.load %arg5[%c0_8, %c0_9] : memref<8x128xbf16, #tpu.memory_space<vmem>>, vector<8x128xbf16>
    tpu.vector_store %arg5[%c0_8, %c0_9], %11 {strides = array<i32>} : memref<8x128xbf16, #tpu.memory_space<vmem>>, vector<8x128xbf16>,
    return
  }
  func.func @transform_0(%arg0: i32) -> (i32, i32) {
    %c0_i32 = arith.constant 0 : i32
    %c0_i32_0 = arith.constant 0 : i32
    return %arg0, %c0_i32 : i32, i32
  }
  func.func @transform_1(%arg0: i32) -> (i32, i32) {
    %c0_i32 = arith.constant 0 : i32
    %c0_i32_0 = arith.constant 0 : i32
    %c0_i32_1 = arith.constant 0 : i32
    return %c0_i32, %c0_i32_0 : i32, i32
  }
  func.func @transform_2(%arg0: i32) -> (i32, i32) {
    %c0_i32 = arith.constant 0 : i32
    %c0_i32_0 = arith.constant 0 : i32
    %c0_i32_1 = arith.constant 0 : i32
    return %c0_i32, %c0_i32_0 : i32, i32
  }
  func.func @transform_3(%arg0: i32) -> (i32, i32) {
    %c0_i32 = arith.constant 0 : i32
    %c0_i32_0 = arith.constant 0 : i32
    return %arg0, %c0_i32 : i32, i32
  }
  func.func @transform_4(%arg0: i32) -> (i32, i32) {
    %c0_i32 = arith.constant 0 : i32
    %c0_i32_0 = arith.constant 0 : i32
    return %arg0, %c0_i32 : i32, i32
  }
}

module attributes {stable_mosaic.version = 11 : i64} {
  func.func @kernel(%arg0: i32, %arg1: memref<8x288xbf16, #tpu.memory_space<vmem>>, %arg2: memref<288x128xbf16, #tpu.memory_space<vmem>>, %arg3: memref<1x128xf32, #tpu.memory_space<vmem>>, %arg4: memref<8x128xbf16, #tpu.memory_space<vmem>>) attributes {dimension_semantics = [#tpu.dimension_semantics<parallel>], iteration_bounds = array<i64: 1>, scalar_prefetch = 0 : i64, scratch_operands = 0 : i64, tpu.core_type = #tpu.core_type<tc>, window_params = [{transform_indices = @transform_0, window_bounds = array<i64: 8, 288>}, {pipeline_mode = #tpu.pipeline_mode<synchronous>, transform_indices = @transform_1, window_bounds = array<i64: 288, 128>}, {pipeline_mode = #tpu.pipeline_mode<synchronous>, transform_indices = @transform_2, window_bounds = array<i64: 1, 128>}, {transform_indices = @transform_3, window_bounds = array<i64: 8, 128>}]} {
    %c0 = arith.constant 0 : index
    %c0_0 = arith.constant 0 : index
    %0 = vector.load %arg1[%c0, %c0_0] : memref<8x288xbf16, #tpu.memory_space<vmem>>, vector<8x288xbf16>
    %c0_1 = arith.constant 0 : index
    %c0_2 = arith.constant 0 : index
    %1 = vector.load %arg2[%c0_1, %c0_2] : memref<288x128xbf16, #tpu.memory_space<vmem>>, vector<288x128xbf16>
    %cst = arith.constant dense<0.000000e+00> : vector<8x128xf32>
    %2 = tpu.matmul %0, %1, %cst {dimension_numbers = #tpu.dot_dimension_numbers<[1], [0], [0], [1], [0, 0, 1, 1], [], []>} : vector<8x288xbf16>, vector<288x128xbf16>, vector<8x128xf32> -> vector<8x128xf32>
    %c0_3 = arith.constant 0 : index
    %c0_4 = arith.constant 0 : index
    %3 = vector.load %arg3[%c0_3, %c0_4] : memref<1x128xf32, #tpu.memory_space<vmem>>, vector<1x128xf32>
    %4 = vector.broadcast %3 : vector<1x128xf32> to vector<8x128xf32>
    %5 = arith.addf %2, %4 : vector<8x128xf32>
    %cst_5 = arith.constant 0.000000e+00 : f32
    %6 = vector.broadcast %cst_5 : f32 to vector<8x128xf32>
    %7 = arith.maximumf %5, %6 : vector<8x128xf32>
    %8 = arith.truncf %7 : vector<8x128xf32> to vector<8x128xbf16>
    %c0_6 = arith.constant 0 : index
    %c0_7 = arith.constant 0 : index
    %9 = vector.load %arg4[%c0_6, %c0_7] : memref<8x128xbf16, #tpu.memory_space<vmem>>, vector<8x128xbf16>
    tpu.vector_store %arg4[%c0_6, %c0_7], %8 {strides = array<i32>} : memref<8x128xbf16, #tpu.memory_space<vmem>>, vector<8x128xbf16>,
    return
  }
  func.func @transform_0(%arg0: i32) -> (i32, i32) {
    %c0_i32 = arith.constant 0 : i32
    %c0_i32_0 = arith.constant 0 : i32
    return %arg0, %c0_i32 : i32, i32
  }
  func.func @transform_1(%arg0: i32) -> (i32, i32) {
    %c0_i32 = arith.constant 0 : i32
    %c0_i32_0 = arith.constant 0 : i32
    %c0_i32_1 = arith.constant 0 : i32
    return %c0_i32, %c0_i32_0 : i32, i32
  }
  func.func @transform_2(%arg0: i32) -> (i32, i32) {
    %c0_i32 = arith.constant 0 : i32
    %c0_i32_0 = arith.constant 0 : i32
    %c0_i32_1 = arith.constant 0 : i32
    return %c0_i32, %c0_i32_0 : i32, i32
  }
  func.func @transform_3(%arg0: i32) -> (i32, i32) {
    %c0_i32 = arith.constant 0 : i32
    %c0_i32_0 = arith.constant 0 : i32
    return %arg0, %c0_i32 : i32, i32
  }
}

module attributes {stable_mosaic.version = 11 : i64} {
  func.func @kernel(%arg0: i32, %arg1: memref<8x32xbf16, #tpu.memory_space<vmem>>, %arg2: memref<32x128xbf16, #tpu.memory_space<vmem>>, %arg3: memref<1x128xf32, #tpu.memory_space<vmem>>, %arg4: memref<8x128xbf16, #tpu.memory_space<vmem>>) attributes {dimension_semantics = [#tpu.dimension_semantics<parallel>], iteration_bounds = array<i64: 1>, scalar_prefetch = 0 : i64, scratch_operands = 0 : i64, tpu.core_type = #tpu.core_type<tc>, window_params = [{transform_indices = @transform_0, window_bounds = array<i64: 8, 32>}, {pipeline_mode = #tpu.pipeline_mode<synchronous>, transform_indices = @transform_1, window_bounds = array<i64: 32, 128>}, {pipeline_mode = #tpu.pipeline_mode<synchronous>, transform_indices = @transform_2, window_bounds = array<i64: 1, 128>}, {transform_indices = @transform_3, window_bounds = array<i64: 8, 128>}]} {
    %c0 = arith.constant 0 : index
    %c0_0 = arith.constant 0 : index
    %0 = vector.load %arg1[%c0, %c0_0] : memref<8x32xbf16, #tpu.memory_space<vmem>>, vector<8x32xbf16>
    %c0_1 = arith.constant 0 : index
    %c0_2 = arith.constant 0 : index
    %1 = vector.load %arg2[%c0_1, %c0_2] : memref<32x128xbf16, #tpu.memory_space<vmem>>, vector<32x128xbf16>
    %cst = arith.constant dense<0.000000e+00> : vector<8x128xf32>
    %2 = tpu.matmul %0, %1, %cst {dimension_numbers = #tpu.dot_dimension_numbers<[1], [0], [0], [1], [0, 0, 1, 1], [], []>} : vector<8x32xbf16>, vector<32x128xbf16>, vector<8x128xf32> -> vector<8x128xf32>
    %c0_3 = arith.constant 0 : index
    %c0_4 = arith.constant 0 : index
    %3 = vector.load %arg3[%c0_3, %c0_4] : memref<1x128xf32, #tpu.memory_space<vmem>>, vector<1x128xf32>
    %4 = vector.broadcast %3 : vector<1x128xf32> to vector<8x128xf32>
    %5 = arith.addf %2, %4 : vector<8x128xf32>
    %6 = arith.truncf %5 : vector<8x128xf32> to vector<8x128xbf16>
    %c0_5 = arith.constant 0 : index
    %c0_6 = arith.constant 0 : index
    %7 = vector.load %arg4[%c0_5, %c0_6] : memref<8x128xbf16, #tpu.memory_space<vmem>>, vector<8x128xbf16>
    tpu.vector_store %arg4[%c0_5, %c0_6], %6 {strides = array<i32>} : memref<8x128xbf16, #tpu.memory_space<vmem>>, vector<8x128xbf16>,
    return
  }
  func.func @transform_0(%arg0: i32) -> (i32, i32) {
    %c0_i32 = arith.constant 0 : i32
    %c0_i32_0 = arith.constant 0 : i32
    return %arg0, %c0_i32 : i32, i32
  }
  func.func @transform_1(%arg0: i32) -> (i32, i32) {
    %c0_i32 = arith.constant 0 : i32
    %c0_i32_0 = arith.constant 0 : i32
    %c0_i32_1 = arith.constant 0 : i32
    return %c0_i32, %c0_i32_0 : i32, i32
  }
  func.func @transform_2(%arg0: i32) -> (i32, i32) {
    %c0_i32 = arith.constant 0 : i32
    %c0_i32_0 = arith.constant 0 : i32
    %c0_i32_1 = arith.constant 0 : i32
    return %c0_i32, %c0_i32_0 : i32, i32
  }
  func.func @transform_3(%arg0: i32) -> (i32, i32) {
    %c0_i32 = arith.constant 0 : i32
    %c0_i32_0 = arith.constant 0 : i32
    return %arg0, %c0_i32 : i32, i32
  }
}

module attributes {stable_mosaic.version = 11 : i64} {
  func.func @kernel(%arg0: i32, %arg1: memref<8x576xbf16, #tpu.memory_space<vmem>>, %arg2: memref<576x128xbf16, #tpu.memory_space<vmem>>, %arg3: memref<1x128xf32, #tpu.memory_space<vmem>>, %arg4: memref<8x128xbf16, #tpu.memory_space<vmem>>, %arg5: memref<8x128xbf16, #tpu.memory_space<vmem>>) attributes {dimension_semantics = [#tpu.dimension_semantics<parallel>], iteration_bounds = array<i64: 1>, scalar_prefetch = 0 : i64, scratch_operands = 0 : i64, tpu.core_type = #tpu.core_type<tc>, window_params = [{transform_indices = @transform_0, window_bounds = array<i64: 8, 576>}, {pipeline_mode = #tpu.pipeline_mode<synchronous>, transform_indices = @transform_1, window_bounds = array<i64: 576, 128>}, {pipeline_mode = #tpu.pipeline_mode<synchronous>, transform_indices = @transform_2, window_bounds = array<i64: 1, 128>}, {transform_indices = @transform_3, window_bounds = array<i64: 8, 128>}, {transform_indices = @transform_4, window_bounds = array<i64: 8, 128>}]} {
    %c0 = arith.constant 0 : index
    %c0_0 = arith.constant 0 : index
    %0 = vector.load %arg1[%c0, %c0_0] : memref<8x576xbf16, #tpu.memory_space<vmem>>, vector<8x576xbf16>
    %c0_1 = arith.constant 0 : index
    %c0_2 = arith.constant 0 : index
    %1 = vector.load %arg2[%c0_1, %c0_2] : memref<576x128xbf16, #tpu.memory_space<vmem>>, vector<576x128xbf16>
    %cst = arith.constant dense<0.000000e+00> : vector<8x128xf32>
    %2 = tpu.matmul %0, %1, %cst {dimension_numbers = #tpu.dot_dimension_numbers<[1], [0], [0], [1], [0, 0, 1, 1], [], []>} : vector<8x576xbf16>, vector<576x128xbf16>, vector<8x128xf32> -> vector<8x128xf32>
    %c0_3 = arith.constant 0 : index
    %c0_4 = arith.constant 0 : index
    %3 = vector.load %arg3[%c0_3, %c0_4] : memref<1x128xf32, #tpu.memory_space<vmem>>, vector<1x128xf32>
    %4 = vector.broadcast %3 : vector<1x128xf32> to vector<8x128xf32>
    %5 = arith.addf %2, %4 : vector<8x128xf32>
    %c0_5 = arith.constant 0 : index
    %c0_6 = arith.constant 0 : index
    %6 = vector.load %arg4[%c0_5, %c0_6] : memref<8x128xbf16, #tpu.memory_space<vmem>>, vector<8x128xbf16>
    %7 = arith.extf %6 : vector<8x128xbf16> to vector<8x128xf32>
    %8 = arith.addf %5, %7 : vector<8x128xf32>
    %cst_7 = arith.constant 0.000000e+00 : f32
    %9 = vector.broadcast %cst_7 : f32 to vector<8x128xf32>
    %10 = arith.maximumf %8, %9 : vector<8x128xf32>
    %11 = arith.truncf %10 : vector<8x128xf32> to vector<8x128xbf16>
    %c0_8 = arith.constant 0 : index
    %c0_9 = arith.constant 0 : index
    %12 = vector.load %arg5[%c0_8, %c0_9] : memref<8x128xbf16, #tpu.memory_space<vmem>>, vector<8x128xbf16>
    tpu.vector_store %arg5[%c0_8, %c0_9], %11 {strides = array<i32>} : memref<8x128xbf16, #tpu.memory_space<vmem>>, vector<8x128xbf16>,
    return
  }
  func.func @transform_0(%arg0: i32) -> (i32, i32) {
    %c0_i32 = arith.constant 0 : i32
    %c0_i32_0 = arith.constant 0 : i32
    return %arg0, %c0_i32 : i32, i32
  }
  func.func @transform_1(%arg0: i32) -> (i32, i32) {
    %c0_i32 = arith.constant 0 : i32
    %c0_i32_0 = arith.constant 0 : i32
    %c0_i32_1 = arith.constant 0 : i32
    return %c0_i32, %c0_i32_0 : i32, i32
  }
  func.func @transform_2(%arg0: i32) -> (i32, i32) {
    %c0_i32 = arith.constant 0 : i32
    %c0_i32_0 = arith.constant 0 : i32
    %c0_i32_1 = arith.constant 0 : i32
    return %c0_i32, %c0_i32_0 : i32, i32
  }
  func.func @transform_3(%arg0: i32) -> (i32, i32) {
    %c0_i32 = arith.constant 0 : i32
    %c0_i32_0 = arith.constant 0 : i32
    return %arg0, %c0_i32 : i32, i32
  }
  func.func @transform_4(%arg0: i32) -> (i32, i32) {
    %c0_i32 = arith.constant 0 : i32
    %c0_i32_0 = arith.constant 0 : i32
    return %arg0, %c0_i32 : i32, i32
  }
}

module attributes {stable_mosaic.version = 11 : i64} {
  func.func @kernel(%arg0: i32, %arg1: memref<8x576xbf16, #tpu.memory_space<vmem>>, %arg2: memref<576x128xbf16, #tpu.memory_space<vmem>>, %arg3: memref<1x128xf32, #tpu.memory_space<vmem>>, %arg4: memref<8x128xbf16, #tpu.memory_space<vmem>>) attributes {dimension_semantics = [#tpu.dimension_semantics<parallel>], iteration_bounds = array<i64: 1>, scalar_prefetch = 0 : i64, scratch_operands = 0 : i64, tpu.core_type = #tpu.core_type<tc>, window_params = [{transform_indices = @transform_0, window_bounds = array<i64: 8, 576>}, {pipeline_mode = #tpu.pipeline_mode<synchronous>, transform_indices = @transform_1, window_bounds = array<i64: 576, 128>}, {pipeline_mode = #tpu.pipeline_mode<synchronous>, transform_indices = @transform_2, window_bounds = array<i64: 1, 128>}, {transform_indices = @transform_3, window_bounds = array<i64: 8, 128>}]} {
    %c0 = arith.constant 0 : index
    %c0_0 = arith.constant 0 : index
    %0 = vector.load %arg1[%c0, %c0_0] : memref<8x576xbf16, #tpu.memory_space<vmem>>, vector<8x576xbf16>
    %c0_1 = arith.constant 0 : index
    %c0_2 = arith.constant 0 : index
    %1 = vector.load %arg2[%c0_1, %c0_2] : memref<576x128xbf16, #tpu.memory_space<vmem>>, vector<576x128xbf16>
    %cst = arith.constant dense<0.000000e+00> : vector<8x128xf32>
    %2 = tpu.matmul %0, %1, %cst {dimension_numbers = #tpu.dot_dimension_numbers<[1], [0], [0], [1], [0, 0, 1, 1], [], []>} : vector<8x576xbf16>, vector<576x128xbf16>, vector<8x128xf32> -> vector<8x128xf32>
    %c0_3 = arith.constant 0 : index
    %c0_4 = arith.constant 0 : index
    %3 = vector.load %arg3[%c0_3, %c0_4] : memref<1x128xf32, #tpu.memory_space<vmem>>, vector<1x128xf32>
    %4 = vector.broadcast %3 : vector<1x128xf32> to vector<8x128xf32>
    %5 = arith.addf %2, %4 : vector<8x128xf32>
    %cst_5 = arith.constant 0.000000e+00 : f32
    %6 = vector.broadcast %cst_5 : f32 to vector<8x128xf32>
    %7 = arith.maximumf %5, %6 : vector<8x128xf32>
    %8 = arith.truncf %7 : vector<8x128xf32> to vector<8x128xbf16>
    %c0_6 = arith.constant 0 : index
    %c0_7 = arith.constant 0 : index
    %9 = vector.load %arg4[%c0_6, %c0_7] : memref<8x128xbf16, #tpu.memory_space<vmem>>, vector<8x128xbf16>
    tpu.vector_store %arg4[%c0_6, %c0_7], %8 {strides = array<i32>} : memref<8x128xbf16, #tpu.memory_space<vmem>>, vector<8x128xbf16>,
    return
  }
  func.func @transform_0(%arg0: i32) -> (i32, i32) {
    %c0_i32 = arith.constant 0 : i32
    %c0_i32_0 = arith.constant 0 : i32
    return %arg0, %c0_i32 : i32, i32
  }
  func.func @transform_1(%arg0: i32) -> (i32, i32) {
    %c0_i32 = arith.constant 0 : i32
    %c0_i32_0 = arith.constant 0 : i32
    %c0_i32_1 = arith.constant 0 : i32
    return %c0_i32, %c0_i32_0 : i32, i32
  }
  func.func @transform_2(%arg0: i32) -> (i32, i32) {
    %c0_i32 = arith.constant 0 : i32
    %c0_i32_0 = arith.constant 0 : i32
    %c0_i32_1 = arith.constant 0 : i32
    return %c0_i32, %c0_i32_0 : i32, i32
  }
  func.func @transform_3(%arg0: i32) -> (i32, i32) {
    %c0_i32 = arith.constant 0 : i32
    %c0_i32_0 = arith.constant 0 : i32
    return %arg0, %c0_i32 : i32, i32
  }
}

module attributes {stable_mosaic.version = 11 : i64} {
  func.func @_avgpool_kernel(%arg0: memref<2x1x128xbf16, #tpu.memory_space<vmem>>, %arg1: memref<2x128xf32, #tpu.memory_space<vmem>>) attributes {dimension_semantics = [], scalar_prefetch = 0 : i64, scratch_operands = 0 : i64, tpu.core_type = #tpu.core_type<tc>} {
    %c0 = arith.constant 0 : index
    %c0_0 = arith.constant 0 : index
    %c0_1 = arith.constant 0 : index
    %0 = vector.load %arg0[%c0, %c0_0, %c0_1] : memref<2x1x128xbf16, #tpu.memory_space<vmem>>, vector<2x1x128xbf16>
    %1 = arith.extf %0 : vector<2x1x128xbf16> to vector<2x1x128xf32>
    %cst = arith.constant dense<0.000000e+00> : vector<2x128xf32>
    %2 = vector.multi_reduction <add>, %1, %cst [1] : vector<2x1x128xf32> to vector<2x128xf32>
    %cst_2 = arith.constant 1.000000e+00 : f32
    %3 = vector.broadcast %cst_2 : f32 to vector<2x128xf32>
    %4 = arith.divf %2, %3 : vector<2x128xf32>
    %c0_3 = arith.constant 0 : index
    %c0_4 = arith.constant 0 : index
    %5 = vector.load %arg1[%c0_3, %c0_4] : memref<2x128xf32, #tpu.memory_space<vmem>>, vector<2x128xf32>
    tpu.vector_store %arg1[%c0_3, %c0_4], %4 {strides = array<i32>} : memref<2x128xf32, #tpu.memory_space<vmem>>, vector<2x128xf32>,
    return
  }
}

</mosaic_0001>

<bundles_post_ra>
// kernel: _lambda_.22
= control target key start
LH: loop header
LB: loop body
LE: loop exit
PB: predicated region body
PF: predicated region fallthrough
CT: control target
= control target key end

     0   :  { %v617_v0 = vmov 0   ;;  %vm210_vm0 = vcmask 556032   ;;  %vm235_vm1 = vcmask 1041408   ;;  %s804_s1 = inlined_call_operand.vmem [shape: bf16[196,128], index: 1, kind: input, shape index: {}]   ;;  %s805_s0 = inlined_call_operand.vmem [shape: bf16[128,196], index: 0, kind: input, shape index: {}]   ;;  %s806_s2 = inlined_call_operand.vmem [shape: f32[1,128], index: 2, kind: input, shape index: {}]   ;;  %s807_s3 = inlined_call_operand.vmem [shape: bf16[128,128], index: 3, kind: output, shape index: {}]  }
   0x1   :  { %239 = vmatprep.subr.bf16.mxu0 %v617_v0  ;;  %553 = vmatprep.subr.bf16.mxu1 %v617_v0  ;;  %v580_v1 = vld [vmem:[%s804_s1 + $0x38] sm:$0xff]   ;;  %v581_v2 = vld [vmem:[%s804_s1 + $0x30] sm:$0xff]   ;;  %v582_v3 = vld [vmem:[%s804_s1 + $0x28] sm:$0xff]  }
   0x2   :  { %240 = vmatpush1.bf16.msra.mxu0 %v580_v1  ;;  %566 = vmatpush1.bf16.msra.mxu1 %v580_v1  ;;  %v583_v4 = vld [vmem:[%s804_s1 + $0x20] sm:$0xff]   ;;  %v584_v6 = vld [vmem:[%s804_s1 + $0x18] sm:$0xff]   ;;  %v585_v8 = vld [vmem:[%s804_s1 + $0x10] sm:$0xff]  }
   0x3   :  { %241 = vmatprep.subr.bf16.mxu0 %v617_v0  ;;  %554 = vmatprep.subr.bf16.mxu1 %v617_v0  ;;  %v595_v5 = vld [vmem:[%s805_s0 + $0x4] ss:$8 sps:$4 sm:$0xff]   ;;  %v588_v11 = vld [vmem:[%s804_s1 + $0x60] ss:$0 sps:$4 sm:$0x33]   ;;  %v589_v13 = vld [vmem:[%s804_s1 + $0x58] sm:$0xff]  }
   0x4   :  { %v598_v7 = vld [vmem:[%s805_s0 + $0x44] ss:$8 sps:$4 sm:$0xff]   ;;  %466 = vmatprep.mubr.msk.bf16.mxu0 %vm210_vm0, %v595_v5  ;;  %v237_v12 = vsel %vm235_vm1, %v588_v11, 0  ;;  %v590_v14 = vld [vmem:[%s804_s1 + $0x50] sm:$0xff]   ;;  %v593_v17 = vld [vmem:[%s805_s0] ss:$8 sps:$4 sm:$0xff]  }
   0x5   :  { %470 = vmatprep.mubr.msk.bf16.mxu1 %vm210_vm0, %v598_v7  ;;  %v586_v9 = vld [vmem:[%s804_s1 + $0x8] sm:$0xff]   ;;  %v587_v10 = vld [vmem:[%s804_s1] sm:$0xff]   ;;  %v599_v19 = vld [vmem:[%s805_s0 + $0x14] ss:$8 sps:$4 sm:$0xff]  }
   0x6   :  { %242 = vmatpush1.bf16.msra.mxu0 %v581_v2  ;;  %567 = vmatpush1.bf16.msra.mxu1 %v581_v2  ;;  %v591_v15 = vld [vmem:[%s804_s1 + $0x48] sm:$0xff]   ;;  %v592_v16 = vld [vmem:[%s804_s1 + $0x40] sm:$0xff]   ;;  %v601_v20 = vld [vmem:[%s805_s0 + $0x54] ss:$8 sps:$4 sm:$0xff]  }
   0x7   :  { %243 = vmatprep.subr.bf16.mxu0 %v617_v0  ;;  %555 = vmatprep.subr.bf16.mxu1 %v617_v0  ;;  %v596_v18 = vld [vmem:[%s805_s0 + $0x40] ss:$8 sps:$4 sm:$0xff]   ;;  %v603_v21 = vld [vmem:[%s805_s0 + $0x10] ss:$8 sps:$4 sm:$0xff]   ;;  %v605_v23 = vld [vmem:[%s805_s0 + $0x24] ss:$8 sps:$4 sm:$0xff]  }
   0x8   :  { %v604_v22 = vld [vmem:[%s805_s0 + $0x50] ss:$8 sps:$4 sm:$0xff]   ;;  %v607_v24 = vld [vmem:[%s805_s0 + $0x64] ss:$8 sps:$4 sm:$0xff]   ;;  %v609_v25 = vld [vmem:[%s805_s0 + $0x20] ss:$8 sps:$4 sm:$0xff]  }
   0x9   :  { %v610_v26 = vld [vmem:[%s805_s0 + $0x60] ss:$8 sps:$4 sm:$0xff]   ;;  %v611_v27 = vld [vmem:[%s805_s0 + $0x34] ss:$8 sps:$4 sm:$0xff]   ;;  %v615_v29 = vld [vmem:[%s805_s0 + $0x30] ss:$8 sps:$4 sm:$0xff]  }
   0xa   :  { %244 = vmatpush1.bf16.msra.mxu0 %v582_v3  ;;  %568 = vmatpush1.bf16.msra.mxu1 %v582_v3  ;;  %v613_v28 = vld [vmem:[%s805_s0 + $0x74] ss:$8 sps:$4 sm:$0xff]   ;;  %v616_v30 = vld [vmem:[%s805_s0 + $0x70] ss:$8 sps:$4 sm:$0xff]   ;;  %v762_v31 = vld [vmem:[%s806_s2] ss:$0 sm:$0xff] }
   0xb   :  { %245 = vmatprep.subr.bf16.mxu0 %v617_v0  ;;  %556 = vmatprep.subr.bf16.mxu1 %v617_v0 }
   0xe   :  { %246 = vmatpush1.bf16.msra.mxu0 %v583_v4  ;;  %569 = vmatpush1.bf16.msra.mxu1 %v583_v4 }
   0xf   :  { %247 = vmatprep.subr.bf16.mxu0 %v617_v0  ;;  %557 = vmatprep.subr.bf16.mxu1 %v617_v0 }
  0x12   :  { %248 = vmatpush1.bf16.msra.mxu0 %v584_v6  ;;  %570 = vmatpush1.bf16.msra.mxu1 %v584_v6 }
  0x13   :  { %249 = vmatprep.subr.bf16.mxu0 %v617_v0  ;;  %558 = vmatprep.subr.bf16.mxu1 %v617_v0 }
  0x16   :  { %250 = vmatpush1.bf16.msra.mxu0 %v585_v8  ;;  %571 = vmatpush1.bf16.msra.mxu1 %v585_v8 }
  0x17   :  { %251 = vmatprep.subr.bf16.mxu0 %v617_v0  ;;  %559 = vmatprep.subr.bf16.mxu1 %v617_v0 }
  0x1a   :  { %252 = vmatpush1.bf16.msra.mxu0 %v586_v9  ;;  %572 = vmatpush1.bf16.msra.mxu1 %v586_v9 }
  0x1b   :  { %253 = vmatprep.subr.bf16.mxu0 %v617_v0  ;;  %560 = vmatprep.subr.bf16.mxu1 %v617_v0 }
  0x1e   :  { %254 = vmatpush1.bf16.msra.mxu0 %v587_v10  ;;  %573 = vmatpush1.bf16.msra.mxu1 %v587_v10 }
  0x1f   :  { %261 = vmatprep.subr.bf16.mxu0 %v617_v0  ;;  %561 = vmatprep.subr.bf16.mxu1 %v617_v0 }
  0x22   :  { %262 = vmatpush2.bf16.msra.mxu0 %v237_v12  ;;  %574 = vmatpush2.bf16.msra.mxu1 %v237_v12 }
  0x23   :  { %263 = vmatprep.subr.bf16.mxu0 %v617_v0  ;;  %562 = vmatprep.subr.bf16.mxu1 %v617_v0 }
  0x26   :  { %264 = vmatpush2.bf16.msra.mxu0 %v589_v13  ;;  %575 = vmatpush2.bf16.msra.mxu1 %v589_v13 }
  0x27   :  { %265 = vmatprep.subr.bf16.mxu0 %v617_v0  ;;  %563 = vmatprep.subr.bf16.mxu1 %v617_v0 }
  0x2a   :  { %266 = vmatpush2.bf16.msra.mxu0 %v590_v14  ;;  %576 = vmatpush2.bf16.msra.mxu1 %v590_v14 }
  0x2b   :  { %267 = vmatprep.subr.bf16.mxu0 %v617_v0  ;;  %564 = vmatprep.subr.bf16.mxu1 %v617_v0 }
  0x2e   :  { %268 = vmatpush2.bf16.msra.mxu0 %v591_v15  ;;  %577 = vmatpush2.bf16.msra.mxu1 %v591_v15 }
  0x2f   :  { %269 = vmatprep.subr.bf16.mxu0 %v617_v0  ;;  %565 = vmatprep.subr.bf16.mxu1 %v617_v0 }
  0x32   :  { %270 = vmatpush2.bf16.msra.mxu0 %v592_v16  ;;  %578 = vmatpush2.bf16.msra.mxu1 %v592_v16 }
  0x35   :  { %272 = vmatmul.mubr.bf16.vlgmr.msra.gmra.mxu0 %v593_v17  ;;  %304 = vmatmul.mubr.bf16.vlgmr.msra.gmra.mxu1 %v596_v18 }
  0x36   :  { %467 = vmatprep.mubr.msk.bf16.mxu0 %vm210_vm0, %v599_v19  ;;  %471 = vmatprep.mubr.msk.bf16.mxu1 %vm210_vm0, %v601_v20 }
  0x3d   :  { %280 = vmatmul.mubr.bf16.gmra.mxu0 %v603_v21  ;;  %312 = vmatmul.mubr.bf16.gmra.mxu1 %v604_v22 }
  0x3e   :  { %468 = vmatprep.mubr.msk.bf16.mxu0 %vm210_vm0, %v605_v23  ;;  %472 = vmatprep.mubr.msk.bf16.mxu1 %vm210_vm0, %v607_v24 }
  0x45   :  { %288 = vmatmul.mubr.bf16.gmra.mxu0 %v609_v25  ;;  %320 = vmatmul.mubr.bf16.gmra.mxu1 %v610_v26 }
  0x46   :  { %469 = vmatprep.mubr.msk.bf16.mxu0 %vm210_vm0, %v611_v27  ;;  %473 = vmatprep.mubr.msk.bf16.mxu1 %vm210_vm0, %v613_v28 }
  0x4d   :  { %296 = vmatmul.mubr.bf16.gmra.mxu0 %v615_v29  ;;  %328 = vmatmul.mubr.bf16.gmra.mxu1 %v616_v30 }
  0xf5   :  { %v273_v32 = vpop.f32.mrf.mxu0  ;;  %v305_v33 = vpop.f32.mrf.mxu1 }
  0xf6   :  { %v274_v36 = vadd.f32 %v762_v31, %v273_v32  ;;  %v306_v37 = vadd.f32 %v762_v31, %v305_v33 }
  0xf7   :  { %v275_v34 = vpop.f32.mrf.mxu0  ;;  %v307_v35 = vpop.f32.mrf.mxu1 }
  0xf8   :  { %v336_v44 = vmax.f32 %v274_v36, 0.0  ;;  %v344_v45 = vmax.f32 %v306_v37, 0.0 }
  0xf9   :  { %v276_v38 = vpop.f32.mrf.mxu0  ;;  %v308_v39 = vpop.f32.mrf.mxu1 }
  0xfa   :  { %v277_v40 = vadd.f32 %v762_v31, %v276_v38  ;;  %v309_v41 = vadd.f32 %v762_v31, %v308_v39 }
  0xfb   :  { %v278_v42 = vpop.f32.mrf.mxu0  ;;  %v310_v43 = vpop.f32.mrf.mxu1 }
  0xfc   :  { %v337_v46 = vmax.f32 %v277_v40, 0.0  ;;  %v345_v47 = vmax.f32 %v309_v41, 0.0 }
  0xfd   :  { %v281_v48 = vpop.f32.mrf.mxu0  ;;  %v313_v49 = vpop.f32.mrf.mxu1 }
  0xfe   :  { %v509_v50 = vpack.c.bf16 %v337_v46, %v336_v44  ;;  %v529_v51 = vpack.c.bf16 %v345_v47, %v344_v45  ;;  %v282_v54 = vadd.f32 %v762_v31, %v281_v48  ;;  %v314_v55 = vadd.f32 %v762_v31, %v313_v49 }
  0xff   :  { %v283_v52 = vpop.f32.mrf.mxu0  ;;  %v315_v53 = vpop.f32.mrf.mxu1 }
 0x100   :  { %510 = vst [vmem:[%s807_s3] sm:$0xff] %v509_v50   ;;  %549 = vst [vmem:[%s807_s3 + $0x20] sm:$0xff] %v529_v51   ;;  %v338_v62 = vmax.f32 %v282_v54, 0.0  ;;  %v346_v63 = vmax.f32 %v314_v55, 0.0 }
 0x101   :  { %v284_v56 = vpop.f32.mrf.mxu0  ;;  %v316_v57 = vpop.f32.mrf.mxu1 }
 0x102   :  { %v285_v58 = vadd.f32 %v762_v31, %v284_v56  ;;  %v317_v59 = vadd.f32 %v762_v31, %v316_v57 }
 0x103   :  { %v286_v60 = vpop.f32.mrf.mxu0  ;;  %v318_v61 = vpop.f32.mrf.mxu1 }
 0x104   :  { %v339_v0 = vmax.f32 %v285_v58, 0.0  ;;  %v347_v1 = vmax.f32 %v317_v59, 0.0 }
 0x105   :  { %v289_v2 = vpop.f32.mrf.mxu0  ;;  %v321_v3 = vpop.f32.mrf.mxu1 }
 0x106   :  { %v514_v4 = vpack.c.bf16 %v339_v0, %v338_v62  ;;  %v534_v5 = vpack.c.bf16 %v347_v1, %v346_v63  ;;  %v290_v8 = vadd.f32 %v762_v31, %v289_v2  ;;  %v322_v9 = vadd.f32 %v762_v31, %v321_v3 }
 0x107   :  { %v291_v6 = vpop.f32.mrf.mxu0  ;;  %v323_v7 = vpop.f32.mrf.mxu1 }
 0x108   :  { %546 = vst [vmem:[%s807_s3 + $0x8] sm:$0xff] %v514_v4   ;;  %550 = vst [vmem:[%s807_s3 + $0x28] sm:$0xff] %v534_v5   ;;  %v340_v16 = vmax.f32 %v290_v8, 0.0  ;;  %v348_v17 = vmax.f32 %v322_v9, 0.0 }
 0x109   :  { %v292_v10 = vpop.f32.mrf.mxu0  ;;  %v324_v11 = vpop.f32.mrf.mxu1 }
 0x10a   :  { %v293_v12 = vadd.f32 %v762_v31, %v292_v10  ;;  %v325_v13 = vadd.f32 %v762_v31, %v324_v11 }
 0x10b   :  { %v294_v14 = vpop.f32.mrf.mxu0  ;;  %v326_v15 = vpop.f32.mrf.mxu1 }
 0x10c   :  { %v341_v18 = vmax.f32 %v293_v12, 0.0  ;;  %v349_v19 = vmax.f32 %v325_v13, 0.0 }
 0x10d   :  { %v297_v20 = vpop.f32.mrf.mxu0  ;;  %v329_v21 = vpop.f32.mrf.mxu1 }
 0x10e   :  { %v519_v22 = vpack.c.bf16 %v341_v18, %v340_v16  ;;  %v539_v23 = vpack.c.bf16 %v349_v19, %v348_v17  ;;  %v298_v26 = vadd.f32 %v762_v31, %v297_v20  ;;  %v330_v27 = vadd.f32 %v762_v31, %v329_v21 }
 0x10f   :  { %v299_v24 = vpop.f32.mrf.mxu0  ;;  %v331_v25 = vpop.f32.mrf.mxu1 }
 0x110   :  { %547 = vst [vmem:[%s807_s3 + $0x10] sm:$0xff] %v519_v22   ;;  %551 = vst [vmem:[%s807_s3 + $0x30] sm:$0xff] %v539_v23   ;;  %v342_v35 = vmax.f32 %v298_v26, 0.0  ;;  %v350_v36 = vmax.f32 %v330_v27, 0.0 }
 0x111   :  { %v300_v28 = vpop.f32.mrf.mxu0  ;;  %v332_v29 = vpop.f32.mrf.mxu1 }
 0x112   :  { %v301_v30 = vadd.f32 %v762_v31, %v300_v28  ;;  %v333_v32 = vadd.f32 %v762_v31, %v332_v29 }
 0x113   :  { %v302_v33 = vpop.f32.mrf.mxu0  ;;  %v334_v34 = vpop.f32.mrf.mxu1 }
 0x114   :  { %v343_v37 = vmax.f32 %v301_v30, 0.0  ;;  %v351_v38 = vmax.f32 %v333_v32, 0.0 }
 0x116   :  { %v524_v39 = vpack.c.bf16 %v343_v37, %v342_v35  ;;  %v544_v40 = vpack.c.bf16 %v351_v38, %v350_v36 }
 0x118   :  { %548 = vst [vmem:[%s807_s3 + $0x18] sm:$0xff] %v524_v39   ;;  %552 = vst [vmem:[%s807_s3 + $0x38] sm:$0xff] %v544_v40  }

// kernel: _lambda_.23
= control target key start
LH: loop header
LB: loop body
LE: loop exit
PB: predicated region body
PF: predicated region fallthrough
CT: control target
= control target key end

     0   :  { %vm45_vm0 = vcmask 1043456   ;;  %s368_s0 = inlined_call_operand.vmem [shape: bf16[9,32,128], index: 0, kind: input, shape index: {}]   ;;  %s369_s1 = inlined_call_operand.vmem [shape: bf16[32,128], index: 1, kind: output, shape index: {}]  }
   0x1   :  { %v9_v0 = vld [vmem:[%s368_s0] sm:$0xf]  ;;  %v13_v1 = vld [vmem:[%s368_s0 + $0x10] sm:$0xf]  ;;  %v10_v3 = vld [vmem:[%s368_s0 + $0x4] sm:$0xf] }
   0x2   :  { %v17_v2 = vld [vmem:[%s368_s0 + $0x20] sm:$0xf]  ;;  %v14_v4 = vld [vmem:[%s368_s0 + $0x14] sm:$0xf]  ;;  %v18_v5 = vld [vmem:[%s368_s0 + $0x24] sm:$0xf] }
   0x3   :  { %v21_v6 = vld [vmem:[%s368_s0 + $0x30] sm:$0xf]  ;;  %v48_v7 = vsel %vm45_vm0, %v9_v0, 4286644096  ;;  %v51_v8 = vsel %vm45_vm0, %v13_v1, 4286644096 }
   0x4   :  { %v55_v9 = vsel %vm45_vm0, %v17_v2, 4286644096  ;;  %v25_v10 = vld [vmem:[%s368_s0 + $0x40] sm:$0xf]  ;;  %v53_v11 = vmax.bf16 %v51_v8, %v48_v7  ;;  %v22_v12 = vld [vmem:[%s368_s0 + $0x34] sm:$0xf] }
   0x5   :  { %v29_v13 = vld [vmem:[%s368_s0 + $0x50] sm:$0xf]  ;;  %v59_v14 = vsel %vm45_vm0, %v21_v6, 4286644096  ;;  %v83_v16 = vsel %vm45_vm0, %v10_v3, 4286644096 }
   0x6   :  { %v57_v15 = vmax.bf16 %v55_v9, %v53_v11  ;;  %v86_v17 = vsel %vm45_vm0, %v14_v4, 4286644096  ;;  %v90_v18 = vsel %vm45_vm0, %v18_v5, 4286644096  ;;  %v26_v19 = vld [vmem:[%s368_s0 + $0x44] sm:$0xf] }
   0x7   :  { %v63_v20 = vsel %vm45_vm0, %v25_v10, 4286644096  ;;  %v88_v21 = vmax.bf16 %v86_v17, %v83_v16  ;;  %v30_v22 = vld [vmem:[%s368_s0 + $0x54] sm:$0xf]  ;;  %v33_v23 = vld [vmem:[%s368_s0 + $0x60] sm:$0xf] }
   0x8   :  { %v61_v24 = vmax.bf16 %v59_v14, %v57_v15  ;;  %v94_v25 = vsel %vm45_vm0, %v22_v12, 4286644096  ;;  %v34_v26 = vld [vmem:[%s368_s0 + $0x64] sm:$0xf]  ;;  %v67_v27 = vsel %vm45_vm0, %v29_v13, 4286644096 }
   0x9   :  { %v92_v28 = vmax.bf16 %v90_v18, %v88_v21  ;;  %v37_v29 = vld [vmem:[%s368_s0 + $0x70] sm:$0xf]  ;;  %v41_v30 = vld [vmem:[%s368_s0 + $0x80] sm:$0xf]  ;;  %v98_v32 = vsel %vm45_vm0, %v26_v19, 4286644096 }
   0xa   :  { %v65_v31 = vmax.bf16 %v63_v20, %v61_v24  ;;  %v38_v33 = vld [vmem:[%s368_s0 + $0x74] sm:$0xf]  ;;  %v71_v34 = vsel %vm45_vm0, %v33_v23, 4286644096  ;;  %v102_v36 = vsel %vm45_vm0, %v30_v22, 4286644096 }
   0xb   :  { %v96_v35 = vmax.bf16 %v94_v25, %v92_v28  ;;  %v42_v37 = vld [vmem:[%s368_s0 + $0x84] sm:$0xf]  ;;  %v11_v39 = vld [vmem:[%s368_s0 + $0x8] sm:$0xf]  ;;  %v15_v40 = vld [vmem:[%s368_s0 + $0x18] sm:$0xf] }
   0xc   :  { %v69_v38 = vmax.bf16 %v67_v27, %v65_v31  ;;  %v19_v41 = vld [vmem:[%s368_s0 + $0x28] sm:$0xf]  ;;  %v75_v42 = vsel %vm45_vm0, %v37_v29, 4286644096  ;;  %v79_v43 = vsel %vm45_vm0, %v41_v30, 4286644096 }
   0xd   :  { %v100_v44 = vmax.bf16 %v98_v32, %v96_v35  ;;  %v106_v45 = vsel %vm45_vm0, %v34_v26, 4286644096  ;;  %v12_v47 = vld [vmem:[%s368_s0 + $0xc] sm:$0xf]  ;;  %v23_v48 = vld [vmem:[%s368_s0 + $0x38] sm:$0xf] }
   0xe   :  { %v73_v46 = vmax.bf16 %v71_v34, %v69_v38  ;;  %v27_v49 = vld [vmem:[%s368_s0 + $0x48] sm:$0xf]  ;;  %v118_v51 = vsel %vm45_vm0, %v11_v39, 4286644096  ;;  %v121_v52 = vsel %vm45_vm0, %v15_v40, 4286644096 }
   0xf   :  { %v104_v50 = vmax.bf16 %v102_v36, %v100_v44  ;;  %v125_v53 = vsel %vm45_vm0, %v19_v41, 4286644096  ;;  %v110_v55 = vsel %vm45_vm0, %v38_v33, 4286644096  ;;  %v16_v56 = vld [vmem:[%s368_s0 + $0x1c] sm:$0xf]  ;;  %v123_v58 = vmax.bf16 %v121_v52, %v118_v51 }
  0x10   :  { %v77_v54 = vmax.bf16 %v75_v42, %v73_v46  ;;  %v20_v57 = vld [vmem:[%s368_s0 + $0x2c] sm:$0xf]  ;;  %v114_v60 = vsel %vm45_vm0, %v42_v37, 4286644096  ;;  %v24_v61 = vld [vmem:[%s368_s0 + $0x3c] sm:$0xf] }
  0x11   :  { %v108_v59 = vmax.bf16 %v106_v45, %v104_v50  ;;  %v129_v62 = vsel %vm45_vm0, %v23_v48, 4286644096  ;;  %v31_v63 = vld [vmem:[%s368_s0 + $0x58] sm:$0xf]  ;;  %v127_v0 = vmax.bf16 %v125_v53, %v123_v58  ;;  %v133_v1 = vsel %vm45_vm0, %v27_v49, 4286644096 }
  0x12   :  { %v153_v2 = vsel %vm45_vm0, %v12_v47, 4286644096  ;;  %v81_v3 = vmax.bf16 %v79_v43, %v77_v54  ;;  %v156_v5 = vsel %vm45_vm0, %v16_v56, 4286644096  ;;  %v160_v6 = vsel %vm45_vm0, %v20_v57, 4286644096 }
  0x13   :  { %v112_v4 = vmax.bf16 %v110_v55, %v108_v59  ;;  %v28_v7 = vld [vmem:[%s368_s0 + $0x4c] sm:$0xf]  ;;  %v35_v8 = vld [vmem:[%s368_s0 + $0x68] sm:$0xf]  ;;  %v131_v9 = vmax.bf16 %v129_v62, %v127_v0  ;;  %v158_v10 = vmax.bf16 %v156_v5, %v153_v2  ;;  %v137_v12 = vsel %vm45_vm0, %v31_v63, 4286644096 }
  0x14   :  { %v164_v13 = vsel %vm45_vm0, %v24_v61, 4286644096  ;;  %v32_v14 = vld [vmem:[%s368_s0 + $0x5c] sm:$0xf]  ;;  %v39_v15 = vld [vmem:[%s368_s0 + $0x78] sm:$0xf] }
  0x15   :  { %v116_v11 = vmax.bf16 %v114_v60, %v112_v4  ;;  %v135_v16 = vmax.bf16 %v133_v1, %v131_v9  ;;  %v162_v17 = vmax.bf16 %v160_v6, %v158_v10  ;;  %v141_v19 = vsel %vm45_vm0, %v35_v8, 4286644096  ;;  %v36_v21 = vld [vmem:[%s368_s0 + $0x6c] sm:$0xf]  ;;  %v40_v26 = vld [vmem:[%s368_s0 + $0x7c] sm:$0xf] }
  0x16   :  { %v168_v20 = vsel %vm45_vm0, %v28_v7, 4286644096  ;;  %v145_v24 = vsel %vm45_vm0, %v39_v15, 4286644096  ;;  %v172_v25 = vsel %vm45_vm0, %v32_v14, 4286644096 }
  0x17   :  { %v205_v18 = vcombine.low %v81_v3, %v116_v11  ;;  %v139_v22 = vmax.bf16 %v137_v12, %v135_v16  ;;  %v166_v23 = vmax.bf16 %v164_v13, %v162_v17  ;;  %v43_v27 = vld [vmem:[%s368_s0 + $0x88] sm:$0xf]  ;;  %v176_v30 = vsel %vm45_vm0, %v36_v21, 4286644096  ;;  %v44_v31 = vld [vmem:[%s368_s0 + $0x8c] sm:$0xf] }
  0x18   :  { %v149_v34 = vsel %vm45_vm0, %v43_v27, 4286644096  ;;  %v180_v35 = vsel %vm45_vm0, %v40_v26, 4286644096  ;;  %v184_v37 = vsel %vm45_vm0, %v44_v31, 4286644096 }
  0x19   :  { %199 = vst [vmem:[%s369_s1] sm:$0xff] %v205_v18   ;;  %v143_v28 = vmax.bf16 %v141_v19, %v139_v22  ;;  %v170_v29 = vmax.bf16 %v168_v20, %v166_v23 }
  0x1b   :  { %v147_v32 = vmax.bf16 %v145_v24, %v143_v28  ;;  %v174_v33 = vmax.bf16 %v172_v25, %v170_v29 }
  0x1d   :  { %v178_v36 = vmax.bf16 %v176_v30, %v174_v33  ;;  %v151_v38 = vmax.bf16 %v149_v34, %v147_v32 }
  0x1f   :  { %v182_v39 = vmax.bf16 %v180_v35, %v178_v36 }
  0x21   :  { %v186_v40 = vmax.bf16 %v184_v37, %v182_v39 }
  0x23   :  { %v206_v41 = vcombine.low %v151_v38, %v186_v40 }
  0x25   :  { %207 = vst [vmem:[%s369_s1 + $0x8] sm:$0xff] %v206_v41  }

// kernel: _lambda_.25
= control target key start
LH: loop header
LB: loop body
LE: loop exit
PB: predicated region body
PF: predicated region fallthrough
CT: control target
= control target key end

     0   :  { %vm82_vm0 = vcmask 1043456   ;;  %vm75_vm1 = vcmask 588800   ;;  %s303_s1 = inlined_call_operand.vmem [shape: bf16[72,128], index: 1, kind: input, shape index: {}]   ;;  %s304_s0 = inlined_call_operand.vmem [shape: bf16[32,72], index: 0, kind: input, shape index: {}]   ;;  %s305_s2 = inlined_call_operand.vmem [shape: f32[1,128], index: 2, kind: input, shape index: {}]   ;;  %s306_s3 = inlined_call_operand.vmem [shape: bf16[32,128], index: 3, kind: input, shape index: {}]   ;;  %s307_s4 = inlined_call_operand.vmem [shape: bf16[32,128], index: 4, kind: output, shape index: {}]  }
   0x1   :  { %v235_v0 = vld [vmem:[%s303_s1 + $0x20] ss:$0 sps:$4 sm:$0xff]   ;;  %v236_v1 = vld [vmem:[%s303_s1 + $0x18] sm:$0xff]   ;;  %v237_v3 = vld [vmem:[%s303_s1 + $0x10] sm:$0xff]  }
   0x2   :  { %234 = vmatprep.subr.msk.bf16.mxu0 %vm82_vm0, %v235_v0  ;;  %v84_v2 = vsel %vm82_vm0, %v235_v0, 0  ;;  %v240_v4 = vld [vmem:[%s304_s0] sm:$0xff]   ;;  %v238_v5 = vld [vmem:[%s303_s1 + $0x8] sm:$0xff]  }
   0x3   :  { %221 = vmatpush3.bf16.msra.mxu0 %v84_v2  ;;  %230 = vmatprep.mubr.msk.bf16.mxu0 %vm75_vm1, %v240_v4  ;;  %v239_v6 = vld [vmem:[%s303_s1] sm:$0xff]   ;;  %v241_v7 = vld [vmem:[%s304_s0 + $0x8] sm:$0xff]  }
   0x4   :  { %222 = vmatprep.subr.bf16.mxu0 %v236_v1  ;;  %v175_v8 = vld [vmem:[%s305_s2] ss:$0 sm:$0xff]  ;;  %v211_v9 = vld [vmem:[%s306_s3 + $0x8] sm:$0xff]  }
   0x5   :  { %v194_v11 = vld [vmem:[%s306_s3] sm:$0xff]   ;;  %v199_v13 = vunpack.c.l.bf16 %v211_v9  ;;  %v200_v17 = vunpack.c.h.bf16 %v211_v9 }
   0x6   :  { %v195_v16 = vunpack.c.l.bf16 %v194_v11  ;;  %v196_v21 = vunpack.c.h.bf16 %v194_v11 }
   0x7   :  { %223 = vmatpush3.bf16.msra.mxu0 %v236_v1 }
   0x8   :  { %224 = vmatprep.subr.bf16.mxu0 %v237_v3 }
   0xb   :  { %225 = vmatpush3.bf16.msra.mxu0 %v237_v3 }
   0xc   :  { %226 = vmatprep.subr.bf16.mxu0 %v238_v5 }
   0xf   :  { %227 = vmatpush3.bf16.msra.mxu0 %v238_v5 }
  0x10   :  { %228 = vmatprep.subr.bf16.mxu0 %v239_v6 }
  0x13   :  { %229 = vmatpush3.bf16.msra.mxu0 %v239_v6 }
  0x16   :  { %231 = vmatmul.mubr.msk.bf16.vlgmr.msra.gmra.mxu0 %vm75_vm1, %v241_v7 }
  0xd6   :  { %v232_v10 = vpop.f32.mrf.mxu0 }
  0xd7   :  { %v129_v12 = vadd.f32 %v232_v10, %v175_v8 }
  0xd8   :  { %v120_v14 = vpop.f32.mrf.mxu0 }
  0xd9   :  { %v121_v15 = vadd.f32 %v175_v8, %v120_v14  ;;  %v145_v19 = vadd.f32 %v199_v13, %v129_v12 }
  0xda   :  { %v233_v18 = vpop.f32.mrf.mxu0 }
  0xdb   :  { %v132_v20 = vadd.f32 %v233_v18, %v175_v8  ;;  %v143_v23 = vadd.f32 %v195_v16, %v121_v15  ;;  %v149_v26 = vmax.f32 %v145_v19, 0.0 }
  0xdc   :  { %v123_v22 = vpop.f32.mrf.mxu0 }
  0xdd   :  { %v146_v24 = vadd.f32 %v200_v17, %v132_v20  ;;  %v124_v25 = vadd.f32 %v175_v8, %v123_v22  ;;  %v147_v29 = vmax.f32 %v143_v23, 0.0 }
  0xdf   :  { %v150_v27 = vmax.f32 %v146_v24, 0.0  ;;  %v144_v28 = vadd.f32 %v196_v21, %v124_v25 }
  0xe1   :  { %v209_v30 = vpack.c.bf16 %v150_v27, %v149_v26  ;;  %v148_v31 = vmax.f32 %v144_v28, 0.0 }
  0xe3   :  { %212 = vst [vmem:[%s307_s4 + $0x8] sm:$0xff] %v209_v30   ;;  %v204_v32 = vpack.c.bf16 %v148_v31, %v147_v29 }
  0xe5   :  { %205 = vst [vmem:[%s307_s4] sm:$0xff] %v204_v32  }

// kernel: _lambda_.24
= control target key start
LH: loop header
LB: loop body
LE: loop exit
PB: predicated region body
PF: predicated region fallthrough
CT: control target
= control target key end

     0   :  { %vm79_vm0 = vcmask 1043456   ;;  %vm72_vm1 = vcmask 588800   ;;  %s268_s1 = inlined_call_operand.vmem [shape: bf16[72,128], index: 1, kind: input, shape index: {}]   ;;  %s269_s0 = inlined_call_operand.vmem [shape: bf16[32,72], index: 0, kind: input, shape index: {}]   ;;  %s270_s2 = inlined_call_operand.vmem [shape: f32[1,128], index: 2, kind: input, shape index: {}]   ;;  %s271_s3 = inlined_call_operand.vmem [shape: bf16[32,128], index: 3, kind: output, shape index: {}]  }
   0x1   :  { %v211_v0 = vld [vmem:[%s268_s1 + $0x20] ss:$0 sps:$4 sm:$0xff]   ;;  %v212_v1 = vld [vmem:[%s268_s1 + $0x18] sm:$0xff]   ;;  %v213_v3 = vld [vmem:[%s268_s1 + $0x10] sm:$0xff]  }
   0x2   :  { %210 = vmatprep.subr.msk.bf16.mxu0 %vm79_vm0, %v211_v0  ;;  %v81_v2 = vsel %vm79_vm0, %v211_v0, 0  ;;  %v216_v4 = vld [vmem:[%s269_s0] sm:$0xff]   ;;  %v214_v5 = vld [vmem:[%s268_s1 + $0x8] sm:$0xff]  }
   0x3   :  { %197 = vmatpush3.bf16.msra.mxu0 %v81_v2  ;;  %206 = vmatprep.mubr.msk.bf16.mxu0 %vm72_vm1, %v216_v4  ;;  %v215_v6 = vld [vmem:[%s268_s1] sm:$0xff]   ;;  %v217_v7 = vld [vmem:[%s269_s0 + $0x8] sm:$0xff]  }
   0x4   :  { %198 = vmatprep.subr.bf16.mxu0 %v212_v1  ;;  %v160_v9 = vld [vmem:[%s270_s2] ss:$0 sm:$0xff] }
   0x7   :  { %199 = vmatpush3.bf16.msra.mxu0 %v212_v1 }
   0x8   :  { %200 = vmatprep.subr.bf16.mxu0 %v213_v3 }
   0xb   :  { %201 = vmatpush3.bf16.msra.mxu0 %v213_v3 }
   0xc   :  { %202 = vmatprep.subr.bf16.mxu0 %v214_v5 }
   0xf   :  { %203 = vmatpush3.bf16.msra.mxu0 %v214_v5 }
  0x10   :  { %204 = vmatprep.subr.bf16.mxu0 %v215_v6 }
  0x13   :  { %205 = vmatpush3.bf16.msra.mxu0 %v215_v6 }
  0x16   :  { %207 = vmatmul.mubr.msk.bf16.vlgmr.msra.gmra.mxu0 %vm72_vm1, %v217_v7 }
  0xd6   :  { %v208_v8 = vpop.f32.mrf.mxu0 }
  0xd7   :  { %v126_v11 = vadd.f32 %v208_v8, %v160_v9 }
  0xd8   :  { %v117_v10 = vpop.f32.mrf.mxu0 }
  0xd9   :  { %v118_v13 = vadd.f32 %v160_v9, %v117_v10  ;;  %v134_v16 = vmax.f32 %v126_v11, 0.0 }
  0xda   :  { %v209_v12 = vpop.f32.mrf.mxu0 }
  0xdb   :  { %v129_v14 = vadd.f32 %v209_v12, %v160_v9  ;;  %v132_v19 = vmax.f32 %v118_v13, 0.0 }
  0xdc   :  { %v120_v15 = vpop.f32.mrf.mxu0 }
  0xdd   :  { %v135_v17 = vmax.f32 %v129_v14, 0.0  ;;  %v121_v18 = vadd.f32 %v160_v9, %v120_v15 }
  0xdf   :  { %v186_v20 = vpack.c.bf16 %v135_v17, %v134_v16  ;;  %v133_v21 = vmax.f32 %v121_v18, 0.0 }
  0xe1   :  { %188 = vst [vmem:[%s271_s3 + $0x8] sm:$0xff] %v186_v20   ;;  %v181_v22 = vpack.c.bf16 %v133_v21, %v132_v19 }
  0xe3   :  { %182 = vst [vmem:[%s271_s3] sm:$0xff] %v181_v22  }

// kernel: _lambda_.29
= control target key start
LH: loop header
LB: loop body
LE: loop exit
PB: predicated region body
PF: predicated region fallthrough
CT: control target
= control target key end

     0   :  { %vm63_vm0 = vcmask 1043456   ;;  %v148_v0 = vmov 0.0   ;;  %vm149_vm1 = vmmov 0   ;;  %vm59_vm2 = vcmask 588800   ;;  %s194_s1 = inlined_call_operand.vmem [shape: bf16[72,128], index: 1, kind: input, shape index: {}]   ;;  %s195_s0 = inlined_call_operand.vmem [shape: bf16[8,72], index: 0, kind: input, shape index: {}]   ;;  %s196_s2 = inlined_call_operand.vmem [shape: f32[1,128], index: 2, kind: input, shape index: {}]   ;;  %s197_s3 = inlined_call_operand.vmem [shape: bf16[8,128], index: 3, kind: output, shape index: {}]  }
   0x1   :  { %127 = vmatprep.subr.bf16.mxu0 %v148_v0  ;;  %v143_v1 = vld [vmem:[%s194_s1 + $0x20] ss:$0 sps:$4 sm:$0xff]   ;;  %137 = vmatprep.mubr.msk.bf16.mxu0 %vm149_vm1, %v148_v0  ;;  %v144_v3 = vld [vmem:[%s194_s1 + $0x18] sm:$0xff]   ;;  %v145_v4 = vld [vmem:[%s194_s1 + $0x10] sm:$0xff]  }
   0x2   :  { %v65_v2 = vsel %vm63_vm0, %v143_v1, 0  ;;  %v146_v5 = vld [vmem:[%s194_s1 + $0x8] sm:$0xff]   ;;  %v147_v6 = vld [vmem:[%s194_s1] sm:$0xff]  }
   0x3   :  { %128 = vmatpush3.bf16.msra.mxu0 %v65_v2  ;;  %v15_v7 = vld [vmem:[%s195_s0] sm:$0xf] }
   0x4   :  { %129 = vmatprep.subr.bf16.mxu0 %v148_v0  ;;  %v114_v8 = vld [vmem:[%s196_s2] ss:$0 sm:$0xff] }
   0x7   :  { %130 = vmatpush3.bf16.msra.mxu0 %v144_v3 }
   0x8   :  { %131 = vmatprep.subr.bf16.mxu0 %v148_v0 }
   0xb   :  { %132 = vmatpush3.bf16.msra.mxu0 %v145_v4 }
   0xc   :  { %133 = vmatprep.subr.bf16.mxu0 %v148_v0 }
   0xf   :  { %134 = vmatpush3.bf16.msra.mxu0 %v146_v5 }
  0x10   :  { %135 = vmatprep.subr.bf16.mxu0 %v148_v0 }
  0x13   :  { %136 = vmatpush3.bf16.msra.mxu0 %v147_v6 }
  0x16   :  { %138 = vmatmul.mubr.msk.bf16.vlgmr.msra.gmra.mxu0 %vm59_vm2, %v15_v7 }
  0xd6   :  { %v101_v9 = vpop.f32.mrf.mxu0 }
  0xd7   :  { %v102_v10 = vadd.f32 %v114_v8, %v101_v9 }
  0xd8   :  { %v139_v11 = vpop.f32.mrf.mxu0 }
  0xd9   :  { %v107_v12 = vmax.f32 %v102_v10, 0.0 }
  0xda   :  { %v104_v13 = vpop.f32.mrf.mxu0 }
  0xdb   :  { %v108_v14 = vpack.c.bf16 %v107_v12, %v107_v12 }
  0xdc   :  { %v140_v15 = vpop.f32.mrf.mxu0 }
  0xdd   :  { %109 = vst [vmem:[%s197_s3] sm:$0xf] %v108_v14 }

// kernel: _lambda_.28
= control target key start
LH: loop header
LB: loop body
LE: loop exit
PB: predicated region body
PF: predicated region fallthrough
CT: control target
= control target key end

     0   :  { %vm28_vm0 = vcmask 1043456   ;;  %v90_v0 = vmov 0.0   ;;  %vm91_vm1 = vmmov 0   ;;  %vm24_vm2 = vcmask 64512   ;;  %s124_s1 = inlined_call_operand.vmem [shape: bf16[8,128], index: 1, kind: input, shape index: {}]   ;;  %s125_s0 = inlined_call_operand.vmem [shape: bf16[8,8], index: 0, kind: input, shape index: {}]   ;;  %s126_s2 = inlined_call_operand.vmem [shape: f32[1,128], index: 2, kind: input, shape index: {}]   ;;  %s127_s3 = inlined_call_operand.vmem [shape: bf16[8,128], index: 3, kind: output, shape index: {}]  }
   0x1   :  { %82 = vmatprep.subr.bf16.mxu0 %v90_v0  ;;  %v16_v1 = vld [vmem:[%s124_s1] sm:$0xf]  ;;  %84 = vmatprep.mubr.msk.bf16.mxu0 %vm91_vm1, %v90_v0 }
   0x2   :  { %v30_v2 = vsel %vm28_vm0, %v16_v1, 0  ;;  %v15_v3 = vld [vmem:[%s125_s0] sm:$0xf] }
   0x3   :  { %83 = vmatpush3.bf16.msra.mxu0 %v30_v2  ;;  %v78_v4 = vld [vmem:[%s126_s2] ss:$0 sm:$0xff] }
   0x6   :  { %85 = vmatmul.mubr.msk.bf16.vlgmr.msra.gmra.mxu0 %vm24_vm2, %v15_v3 }
  0xc6   :  { %v66_v5 = vpop.f32.mrf.mxu0 }
  0xc7   :  { %v67_v6 = vadd.f32 %v78_v4, %v66_v5 }
  0xc8   :  { %v86_v7 = vpop.f32.mrf.mxu0 }
  0xc9   :  { %v72_v8 = vpack.c.bf16 %v67_v6, %v67_v6 }
  0xca   :  { %v69_v9 = vpop.f32.mrf.mxu0 }
  0xcb   :  { %73 = vst [vmem:[%s127_s3] sm:$0xf] %v72_v8 }
  0xcc   :  { %v87_v10 = vpop.f32.mrf.mxu0 }

// kernel: _lambda_.31
= control target key start
LH: loop header
LB: loop body
LE: loop exit
PB: predicated region body
PF: predicated region fallthrough
CT: control target
= control target key end

     0   :  { %v177_v0 = vmov 0   ;;  %vm101_vm0 = vcmask 130048   ;;  %s234_s1 = inlined_call_operand.vmem [shape: bf16[144,128], index: 1, kind: input, shape index: {}]   ;;  %s235_s0 = inlined_call_operand.vmem [shape: bf16[8,144], index: 0, kind: input, shape index: {}]   ;;  %s236_s2 = inlined_call_operand.vmem [shape: f32[1,128], index: 2, kind: input, shape index: {}]   ;;  %s237_s3 = inlined_call_operand.vmem [shape: bf16[8,128], index: 3, kind: output, shape index: {}]  }
   0x1   :  { %105 = vmatprep.subr.bf16.mxu0 %v177_v0  ;;  %v166_v1 = vld [vmem:[%s234_s1 + $0x38] sm:$0xff]   ;;  %v167_v2 = vld [vmem:[%s234_s1 + $0x30] sm:$0xff]   ;;  %v168_v3 = vld [vmem:[%s234_s1 + $0x28] sm:$0xff]  }
   0x2   :  { %106 = vmatpush1.bf16.msra.mxu0 %v166_v1  ;;  %v15_v4 = vld [vmem:[%s235_s0] sm:$0xff]  ;;  %v170_v7 = vld [vmem:[%s234_s1 + $0x18] sm:$0xff]   ;;  %v171_v8 = vld [vmem:[%s234_s1 + $0x10] sm:$0xff]  }
   0x3   :  { %107 = vmatprep.subr.bf16.mxu0 %v177_v0  ;;  %v169_v5 = vld [vmem:[%s234_s1 + $0x20] sm:$0xff]   ;;  %v154_v6 = vcombine.high %v15_v4, %v15_v4  ;;  %v172_v9 = vld [vmem:[%s234_s1 + $0x8] sm:$0xff]   ;;  %v153_v12 = vcombine.low %v15_v4, %v15_v4 }
   0x4   :  { %v173_v10 = vld [vmem:[%s234_s1] sm:$0xff]  }
   0x5   :  { %164 = vmatprep.mubr.msk.bf16.mxu0 %vm101_vm0, %v154_v6  ;;  %v174_v11 = vld [vmem:[%s234_s1 + $0x40] sm:$0xff]  }
   0x6   :  { %108 = vmatpush1.bf16.msra.mxu0 %v167_v2  ;;  %v152_v13 = vld [vmem:[%s236_s2] ss:$0 sm:$0xff] }
   0x7   :  { %109 = vmatprep.subr.bf16.mxu0 %v177_v0 }
   0xa   :  { %110 = vmatpush1.bf16.msra.mxu0 %v168_v3 }
   0xb   :  { %111 = vmatprep.subr.bf16.mxu0 %v177_v0 }
   0xe   :  { %112 = vmatpush1.bf16.msra.mxu0 %v169_v5 }
   0xf   :  { %113 = vmatprep.subr.bf16.mxu0 %v177_v0 }
  0x12   :  { %114 = vmatpush1.bf16.msra.mxu0 %v170_v7 }
  0x13   :  { %115 = vmatprep.subr.bf16.mxu0 %v177_v0 }
  0x16   :  { %116 = vmatpush1.bf16.msra.mxu0 %v171_v8 }
  0x17   :  { %117 = vmatprep.subr.bf16.mxu0 %v177_v0 }
  0x1a   :  { %118 = vmatpush1.bf16.msra.mxu0 %v172_v9 }
  0x1b   :  { %119 = vmatprep.subr.bf16.mxu0 %v177_v0 }
  0x1e   :  { %120 = vmatpush1.bf16.msra.mxu0 %v173_v10 }
  0x1f   :  { %135 = vmatprep.subr.bf16.mxu0 %v177_v0 }
  0x22   :  { %136 = vmatpush2.bf16.msra.mxu0 %v174_v11 }
  0x25   :  { %138 = vmatmul.mubr.bf16.vlgmr.msra.gmra.mxu0 %v153_v12 }
  0xe5   :  { %v139_v14 = vpop.f32.mrf.mxu0 }
  0xe6   :  { %v140_v15 = vadd.f32 %v152_v13, %v139_v14 }
  0xe7   :  { %v141_v16 = vpop.f32.mrf.mxu0 }
  0xe8   :  { %v145_v17 = vmax.f32 %v140_v15, 0.0 }
  0xe9   :  { %v142_v18 = vpop.f32.mrf.mxu0 }
  0xea   :  { %v146_v19 = vpack.c.bf16 %v145_v17, %v145_v17 }
  0xeb   :  { %v143_v20 = vpop.f32.mrf.mxu0 }
  0xec   :  { %147 = vst [vmem:[%s237_s3] sm:$0xf] %v146_v19 }

// kernel: _lambda_.30
= control target key start
LH: loop header
LB: loop body
LE: loop exit
PB: predicated region body
PF: predicated region fallthrough
CT: control target
= control target key end

     0   :  { %v183_v0 = vmov 0   ;;  %vm104_vm0 = vcmask 130048   ;;  %s248_s1 = inlined_call_operand.vmem [shape: bf16[144,128], index: 1, kind: input, shape index: {}]   ;;  %s249_s0 = inlined_call_operand.vmem [shape: bf16[8,144], index: 0, kind: input, shape index: {}]   ;;  %s250_s3 = inlined_call_operand.vmem [shape: bf16[8,128], index: 3, kind: input, shape index: {}]   ;;  %s251_s2 = inlined_call_operand.vmem [shape: f32[1,128], index: 2, kind: input, shape index: {}]   ;;  %s252_s4 = inlined_call_operand.vmem [shape: bf16[8,128], index: 4, kind: output, shape index: {}]  }
   0x1   :  { %108 = vmatprep.subr.bf16.mxu0 %v183_v0  ;;  %v172_v1 = vld [vmem:[%s248_s1 + $0x38] sm:$0xff]   ;;  %v173_v2 = vld [vmem:[%s248_s1 + $0x30] sm:$0xff]   ;;  %v174_v3 = vld [vmem:[%s248_s1 + $0x28] sm:$0xff]  }
   0x2   :  { %109 = vmatpush1.bf16.msra.mxu0 %v172_v1  ;;  %v18_v4 = vld [vmem:[%s249_s0] sm:$0xff]  ;;  %v176_v7 = vld [vmem:[%s248_s1 + $0x18] sm:$0xff]   ;;  %v177_v8 = vld [vmem:[%s248_s1 + $0x10] sm:$0xff]  }
   0x3   :  { %110 = vmatprep.subr.bf16.mxu0 %v183_v0  ;;  %v175_v5 = vld [vmem:[%s248_s1 + $0x20] sm:$0xff]   ;;  %v160_v6 = vcombine.high %v18_v4, %v18_v4  ;;  %v178_v9 = vld [vmem:[%s248_s1 + $0x8] sm:$0xff]   ;;  %v159_v12 = vcombine.low %v18_v4, %v18_v4 }
   0x4   :  { %v179_v10 = vld [vmem:[%s248_s1] sm:$0xff]  }
   0x5   :  { %170 = vmatprep.mubr.msk.bf16.mxu0 %vm104_vm0, %v160_v6  ;;  %v180_v11 = vld [vmem:[%s248_s1 + $0x40] sm:$0xff]  }
   0x6   :  { %111 = vmatpush1.bf16.msra.mxu0 %v173_v2  ;;  %v148_v13 = vld [vmem:[%s250_s3] sm:$0xf] }
   0x7   :  { %112 = vmatprep.subr.bf16.mxu0 %v183_v0  ;;  %v158_v14 = vld [vmem:[%s251_s2] ss:$0 sm:$0xff]  ;;  %v149_v15 = vunpack.c.l.bf16 %v148_v13 }
   0xa   :  { %113 = vmatpush1.bf16.msra.mxu0 %v174_v3 }
   0xb   :  { %114 = vmatprep.subr.bf16.mxu0 %v183_v0 }
   0xe   :  { %115 = vmatpush1.bf16.msra.mxu0 %v175_v5 }
   0xf   :  { %116 = vmatprep.subr.bf16.mxu0 %v183_v0 }
  0x12   :  { %117 = vmatpush1.bf16.msra.mxu0 %v176_v7 }
  0x13   :  { %118 = vmatprep.subr.bf16.mxu0 %v183_v0 }
  0x16   :  { %119 = vmatpush1.bf16.msra.mxu0 %v177_v8 }
  0x17   :  { %120 = vmatprep.subr.bf16.mxu0 %v183_v0 }
  0x1a   :  { %121 = vmatpush1.bf16.msra.mxu0 %v178_v9 }
  0x1b   :  { %122 = vmatprep.subr.bf16.mxu0 %v183_v0 }
  0x1e   :  { %123 = vmatpush1.bf16.msra.mxu0 %v179_v10 }
  0x1f   :  { %138 = vmatprep.subr.bf16.mxu0 %v183_v0 }
  0x22   :  { %139 = vmatpush2.bf16.msra.mxu0 %v180_v11 }
  0x25   :  { %141 = vmatmul.mubr.bf16.vlgmr.msra.gmra.mxu0 %v159_v12 }
  0xe5   :  { %v142_v16 = vpop.f32.mrf.mxu0 }
  0xe6   :  { %v143_v17 = vadd.f32 %v158_v14, %v142_v16 }
  0xe7   :  { %v144_v18 = vpop.f32.mrf.mxu0 }
  0xe8   :  { %v150_v19 = vadd.f32 %v149_v15, %v143_v17 }
  0xe9   :  { %v145_v20 = vpop.f32.mrf.mxu0 }
  0xea   :  { %v151_v21 = vmax.f32 %v150_v19, 0.0 }
  0xeb   :  { %v146_v22 = vpop.f32.mrf.mxu0 }
  0xec   :  { %v152_v23 = vpack.c.bf16 %v151_v21, %v151_v21 }
  0xee   :  { %153 = vst [vmem:[%s252_s4] sm:$0xf] %v152_v23 }

// kernel: _lambda_.33
= control target key start
LH: loop header
LB: loop body
LE: loop exit
PB: predicated region body
PF: predicated region fallthrough
CT: control target
= control target key end

     0   :  { %v95_v0 = vmov 0.0   ;;  %vm96_vm0 = vmmov 0   ;;  %vm31_vm1 = vcmask 130048   ;;  %s129_s1 = inlined_call_operand.vmem [shape: bf16[16,128], index: 1, kind: input, shape index: {}]   ;;  %s130_s0 = inlined_call_operand.vmem [shape: bf16[8,16], index: 0, kind: input, shape index: {}]   ;;  %s131_s2 = inlined_call_operand.vmem [shape: f32[1,128], index: 2, kind: input, shape index: {}]   ;;  %s132_s3 = inlined_call_operand.vmem [shape: bf16[8,128], index: 3, kind: output, shape index: {}]  }
   0x1   :  { %86 = vmatprep.subr.bf16.mxu0 %v95_v0  ;;  %v94_v1 = vld [vmem:[%s129_s1] sm:$0xff]   ;;  %88 = vmatprep.mubr.msk.bf16.mxu0 %vm96_vm0, %v95_v0 }
   0x2   :  { %87 = vmatpush3.bf16.msra.mxu0 %v94_v1  ;;  %v15_v2 = vld [vmem:[%s130_s0] sm:$0xf] }
   0x3   :  { %v81_v3 = vld [vmem:[%s131_s2] ss:$0 sm:$0xff] }
   0x5   :  { %89 = vmatmul.mubr.msk.bf16.vlgmr.msra.gmra.mxu0 %vm31_vm1, %v15_v2 }
  0xc5   :  { %v69_v4 = vpop.f32.mrf.mxu0 }
  0xc6   :  { %v70_v5 = vadd.f32 %v81_v3, %v69_v4 }
  0xc7   :  { %v90_v6 = vpop.f32.mrf.mxu0 }
  0xc8   :  { %v75_v7 = vpack.c.bf16 %v70_v5, %v70_v5 }
  0xc9   :  { %v72_v8 = vpop.f32.mrf.mxu0 }
  0xca   :  { %76 = vst [vmem:[%s132_s3] sm:$0xf] %v75_v7 }
  0xcb   :  { %v91_v9 = vpop.f32.mrf.mxu0 }

// kernel: _lambda_.35
= control target key start
LH: loop header
LB: loop body
LE: loop exit
PB: predicated region body
PF: predicated region fallthrough
CT: control target
= control target key end

     0   :  { %v354_v1 = vmov 0.0   ;;  %vm355_vm0 = vmmov 0   ;;  %vm181_vm1 = vcmask 261120   ;;  %s450_s1 = inlined_call_operand.vmem [shape: bf16[288,128], index: 1, kind: input, shape index: {}]   ;;  %s451_s0 = inlined_call_operand.vmem [shape: bf16[8,288], index: 0, kind: input, shape index: {}]   ;;  %s452_s2 = inlined_call_operand.vmem [shape: f32[1,128], index: 2, kind: input, shape index: {}]   ;;  %s453_s3 = inlined_call_operand.vmem [shape: bf16[8,128], index: 3, kind: input, shape index: {}]   ;;  %s454_s4 = inlined_call_operand.vmem [shape: bf16[8,128], index: 4, kind: output, shape index: {}]  }
   0x1   :  { %v333_v0 = vld [vmem:[%s450_s1 + $0x78] sm:$0xff]   ;;  %323 = vmatprep.subr.bf16.mxu1 %v354_v1  ;;  %327 = vmatprep.mubr.msk.bf16.mxu1 %vm355_vm0, %v354_v1  ;;  %v335_v3 = vld [vmem:[%s450_s1 + $0x70] sm:$0xff]   ;;  %v337_v5 = vld [vmem:[%s450_s1 + $0x68] sm:$0xff]  }
   0x2   :  { %v334_v2 = vld [vmem:[%s450_s1 + $0x38] sm:$0xff]   ;;  %298 = vmatprep.subr.bf16.mxu0 %v333_v0  ;;  %v336_v4 = vld [vmem:[%s450_s1 + $0x30] sm:$0xff]   ;;  %v338_v6 = vld [vmem:[%s450_s1 + $0x28] sm:$0xff]  }
   0x3   :  { %299 = vmatpush3.bf16.msra.mxu0 %v334_v2  ;;  %v339_v7 = vld [vmem:[%s450_s1 + $0x60] sm:$0xff]   ;;  %v341_v9 = vld [vmem:[%s450_s1 + $0x58] sm:$0xff]   ;;  %v347_v10 = vld [vmem:[%s450_s1 + $0x88] sm:$0xff]  }
   0x4   :  { %300 = vmatprep.subr.bf16.mxu0 %v335_v3  ;;  %v340_v8 = vld [vmem:[%s450_s1 + $0x20] sm:$0xff]   ;;  %v342_v11 = vld [vmem:[%s450_s1 + $0x18] sm:$0xff]   ;;  %v343_v12 = vld [vmem:[%s450_s1 + $0x50] sm:$0xff]   ;;  %324 = vmatpush3.bf16.msra.mxu1 %v347_v10 }
   0x5   :  { %325 = vmatprep.subr.bf16.mxu1 %v354_v1  ;;  %v350_v13 = vld [vmem:[%s450_s1 + $0x80] sm:$0xff]   ;;  %v344_v15 = vld [vmem:[%s450_s1 + $0x10] sm:$0xff]   ;;  %v353_v17 = vld [vmem:[%s451_s0 + $0x8] ss:$0 sps:$4 sm:$0xff]  }
   0x6   :  { %v18_v14 = vld [vmem:[%s451_s0] sm:$0xff]  ;;  %v345_v18 = vld [vmem:[%s450_s1 + $0x48] sm:$0xff]  }
   0x7   :  { %301 = vmatpush3.bf16.msra.mxu0 %v336_v4  ;;  %v277_v16 = vcombine.high %v18_v14, %v18_v14  ;;  %v346_v19 = vld [vmem:[%s450_s1 + $0x8] sm:$0xff]   ;;  %v348_v20 = vld [vmem:[%s450_s1 + $0x40] sm:$0xff]   ;;  %v276_v22 = vcombine.low %v18_v14, %v18_v14 }
   0x8   :  { %302 = vmatprep.subr.bf16.mxu0 %v337_v5  ;;  %326 = vmatpush3.bf16.msra.mxu1 %v350_v13  ;;  %v349_v21 = vld [vmem:[%s450_s1] sm:$0xff]  }
   0x9   :  { %217 = vmatprep.mubr.bf16.mxu0 %v277_v16  ;;  %v275_v28 = vld [vmem:[%s452_s2] ss:$0 sm:$0xff] }
   0xa   :  { %v265_v30 = vld [vmem:[%s453_s3] sm:$0xf] }
   0xb   :  { %303 = vmatpush3.bf16.msra.mxu0 %v338_v6  ;;  %328 = vmatmul.mubr.msk.bf16.vlgmr.msra.gmra.mxu1 %vm181_vm1, %v353_v17  ;;  %v266_v34 = vunpack.c.l.bf16 %v265_v30 }
   0xc   :  { %304 = vmatprep.subr.bf16.mxu0 %v339_v7 }
   0xf   :  { %305 = vmatpush3.bf16.msra.mxu0 %v340_v8 }
  0x10   :  { %306 = vmatprep.subr.bf16.mxu0 %v341_v9 }
  0x13   :  { %307 = vmatpush3.bf16.msra.mxu0 %v342_v11 }
  0x14   :  { %308 = vmatprep.subr.bf16.mxu0 %v343_v12 }
  0x17   :  { %309 = vmatpush3.bf16.msra.mxu0 %v344_v15 }
  0x18   :  { %310 = vmatprep.subr.bf16.mxu0 %v345_v18 }
  0x1b   :  { %311 = vmatpush3.bf16.msra.mxu0 %v346_v19 }
  0x1c   :  { %312 = vmatprep.subr.bf16.mxu0 %v348_v20 }
  0x1f   :  { %313 = vmatpush3.bf16.msra.mxu0 %v349_v21 }
  0x22   :  { %218 = vmatmul.mubr.bf16.vlgmr.msra.gmra.mxu0 %v276_v22 }
  0xcb   :  { %v259_v23 = vpop.f32.mrf.mxu1 }
  0xcd   :  { %v329_v24 = vpop.f32.mrf.mxu1 }
  0xcf   :  { %v262_v25 = vpop.f32.mrf.mxu1 }
  0xd1   :  { %v330_v26 = vpop.f32.mrf.mxu1 }
  0xe2   :  { %v314_v27 = vpop.f32.mrf.mxu0 }
  0xe4   :  { %v315_v29 = vpop.f32.mrf.mxu0 }
  0xe5   :  { %v316_v31 = vadd.f32 %v315_v29, %v314_v27 }
  0xe6   :  { %v317_v32 = vpop.f32.mrf.mxu0 }
  0xe7   :  { %v220_v33 = vadd.f32 %v316_v31, %v275_v28 }
  0xe8   :  { %v318_v35 = vpop.f32.mrf.mxu0 }
  0xe9   :  { %v260_v36 = vadd.f32 %v259_v23, %v220_v33 }
  0xeb   :  { %v267_v37 = vadd.f32 %v266_v34, %v260_v36 }
  0xed   :  { %v268_v38 = vmax.f32 %v267_v37, 0.0 }
  0xef   :  { %v269_v39 = vpack.c.bf16 %v268_v38, %v268_v38 }
  0xf1   :  { %270 = vst [vmem:[%s454_s4] sm:$0xf] %v269_v39 }

// kernel: _lambda_.36
= control target key start
LH: loop header
LB: loop body
LE: loop exit
PB: predicated region body
PF: predicated region fallthrough
CT: control target
= control target key end

     0   :  { %v348_v1 = vmov 0.0   ;;  %vm349_vm0 = vmmov 0   ;;  %vm178_vm1 = vcmask 261120   ;;  %s436_s1 = inlined_call_operand.vmem [shape: bf16[288,128], index: 1, kind: input, shape index: {}]   ;;  %s437_s0 = inlined_call_operand.vmem [shape: bf16[8,288], index: 0, kind: input, shape index: {}]   ;;  %s438_s2 = inlined_call_operand.vmem [shape: f32[1,128], index: 2, kind: input, shape index: {}]   ;;  %s439_s3 = inlined_call_operand.vmem [shape: bf16[8,128], index: 3, kind: output, shape index: {}]  }
   0x1   :  { %v327_v0 = vld [vmem:[%s436_s1 + $0x78] sm:$0xff]   ;;  %317 = vmatprep.subr.bf16.mxu1 %v348_v1  ;;  %321 = vmatprep.mubr.msk.bf16.mxu1 %vm349_vm0, %v348_v1  ;;  %v329_v3 = vld [vmem:[%s436_s1 + $0x70] sm:$0xff]   ;;  %v331_v5 = vld [vmem:[%s436_s1 + $0x68] sm:$0xff]  }
   0x2   :  { %v328_v2 = vld [vmem:[%s436_s1 + $0x38] sm:$0xff]   ;;  %292 = vmatprep.subr.bf16.mxu0 %v327_v0  ;;  %v330_v4 = vld [vmem:[%s436_s1 + $0x30] sm:$0xff]   ;;  %v332_v6 = vld [vmem:[%s436_s1 + $0x28] sm:$0xff]  }
   0x3   :  { %293 = vmatpush3.bf16.msra.mxu0 %v328_v2  ;;  %v333_v7 = vld [vmem:[%s436_s1 + $0x60] sm:$0xff]   ;;  %v335_v9 = vld [vmem:[%s436_s1 + $0x58] sm:$0xff]   ;;  %v341_v10 = vld [vmem:[%s436_s1 + $0x88] sm:$0xff]  }
   0x4   :  { %294 = vmatprep.subr.bf16.mxu0 %v329_v3  ;;  %v334_v8 = vld [vmem:[%s436_s1 + $0x20] sm:$0xff]   ;;  %v336_v11 = vld [vmem:[%s436_s1 + $0x18] sm:$0xff]   ;;  %v337_v12 = vld [vmem:[%s436_s1 + $0x50] sm:$0xff]   ;;  %318 = vmatpush3.bf16.msra.mxu1 %v341_v10 }
   0x5   :  { %319 = vmatprep.subr.bf16.mxu1 %v348_v1  ;;  %v344_v13 = vld [vmem:[%s436_s1 + $0x80] sm:$0xff]   ;;  %v338_v15 = vld [vmem:[%s436_s1 + $0x10] sm:$0xff]   ;;  %v347_v17 = vld [vmem:[%s437_s0 + $0x8] ss:$0 sps:$4 sm:$0xff]  }
   0x6   :  { %v15_v14 = vld [vmem:[%s437_s0] sm:$0xff]  ;;  %v339_v18 = vld [vmem:[%s436_s1 + $0x48] sm:$0xff]  }
   0x7   :  { %295 = vmatpush3.bf16.msra.mxu0 %v330_v4  ;;  %v271_v16 = vcombine.high %v15_v14, %v15_v14  ;;  %v340_v19 = vld [vmem:[%s436_s1 + $0x8] sm:$0xff]   ;;  %v342_v20 = vld [vmem:[%s436_s1 + $0x40] sm:$0xff]   ;;  %v270_v22 = vcombine.low %v15_v14, %v15_v14 }
   0x8   :  { %296 = vmatprep.subr.bf16.mxu0 %v331_v5  ;;  %320 = vmatpush3.bf16.msra.mxu1 %v344_v13  ;;  %v343_v21 = vld [vmem:[%s436_s1] sm:$0xff]  }
   0x9   :  { %214 = vmatprep.mubr.bf16.mxu0 %v271_v16  ;;  %v269_v28 = vld [vmem:[%s438_s2] ss:$0 sm:$0xff] }
   0xb   :  { %297 = vmatpush3.bf16.msra.mxu0 %v332_v6  ;;  %322 = vmatmul.mubr.msk.bf16.vlgmr.msra.gmra.mxu1 %vm178_vm1, %v347_v17 }
   0xc   :  { %298 = vmatprep.subr.bf16.mxu0 %v333_v7 }
   0xf   :  { %299 = vmatpush3.bf16.msra.mxu0 %v334_v8 }
  0x10   :  { %300 = vmatprep.subr.bf16.mxu0 %v335_v9 }
  0x13   :  { %301 = vmatpush3.bf16.msra.mxu0 %v336_v11 }
  0x14   :  { %302 = vmatprep.subr.bf16.mxu0 %v337_v12 }
  0x17   :  { %303 = vmatpush3.bf16.msra.mxu0 %v338_v15 }
  0x18   :  { %304 = vmatprep.subr.bf16.mxu0 %v339_v18 }
  0x1b   :  { %305 = vmatpush3.bf16.msra.mxu0 %v340_v19 }
  0x1c   :  { %306 = vmatprep.subr.bf16.mxu0 %v342_v20 }
  0x1f   :  { %307 = vmatpush3.bf16.msra.mxu0 %v343_v21 }
  0x22   :  { %215 = vmatmul.mubr.bf16.vlgmr.msra.gmra.mxu0 %v270_v22 }
  0xcb   :  { %v256_v23 = vpop.f32.mrf.mxu1 }
  0xcd   :  { %v323_v24 = vpop.f32.mrf.mxu1 }
  0xcf   :  { %v259_v25 = vpop.f32.mrf.mxu1 }
  0xd1   :  { %v324_v26 = vpop.f32.mrf.mxu1 }
  0xe2   :  { %v308_v27 = vpop.f32.mrf.mxu0 }
  0xe4   :  { %v309_v29 = vpop.f32.mrf.mxu0 }
  0xe5   :  { %v310_v30 = vadd.f32 %v309_v29, %v308_v27 }
  0xe6   :  { %v311_v31 = vpop.f32.mrf.mxu0 }
  0xe7   :  { %v217_v32 = vadd.f32 %v310_v30, %v269_v28 }
  0xe8   :  { %v312_v33 = vpop.f32.mrf.mxu0 }
  0xe9   :  { %v257_v34 = vadd.f32 %v256_v23, %v217_v32 }
  0xeb   :  { %v262_v35 = vmax.f32 %v257_v34, 0.0 }
  0xed   :  { %v263_v36 = vpack.c.bf16 %v262_v35, %v262_v35 }
  0xef   :  { %264 = vst [vmem:[%s439_s3] sm:$0xf] %v263_v36 }

// kernel: _lambda_.38
= control target key start
LH: loop header
LB: loop body
LE: loop exit
PB: predicated region body
PF: predicated region fallthrough
CT: control target
= control target key end

     0   :  { %v108_v0 = vmov 0.0   ;;  %vm109_vm0 = vmmov 0   ;;  %vm39_vm1 = vcmask 261120   ;;  %s145_s1 = inlined_call_operand.vmem [shape: bf16[32,128], index: 1, kind: input, shape index: {}]   ;;  %s146_s0 = inlined_call_operand.vmem [shape: bf16[8,32], index: 0, kind: input, shape index: {}]   ;;  %s147_s2 = inlined_call_operand.vmem [shape: f32[1,128], index: 2, kind: input, shape index: {}]   ;;  %s148_s3 = inlined_call_operand.vmem [shape: bf16[8,128], index: 3, kind: output, shape index: {}]  }
   0x1   :  { %96 = vmatprep.subr.bf16.mxu0 %v108_v0  ;;  %v106_v1 = vld [vmem:[%s145_s1 + $0x8] sm:$0xff]   ;;  %100 = vmatprep.mubr.msk.bf16.mxu0 %vm109_vm0, %v108_v0  ;;  %v107_v2 = vld [vmem:[%s145_s1] sm:$0xff]  }
   0x2   :  { %97 = vmatpush3.bf16.msra.mxu0 %v106_v1  ;;  %v15_v3 = vld [vmem:[%s146_s0] sm:$0xf] }
   0x3   :  { %98 = vmatprep.subr.bf16.mxu0 %v108_v0  ;;  %v89_v4 = vld [vmem:[%s147_s2] ss:$0 sm:$0xff] }
   0x6   :  { %99 = vmatpush3.bf16.msra.mxu0 %v107_v2 }
   0x9   :  { %101 = vmatmul.mubr.msk.bf16.vlgmr.msra.gmra.mxu0 %vm39_vm1, %v15_v3 }
  0xc9   :  { %v77_v5 = vpop.f32.mrf.mxu0 }
  0xca   :  { %v78_v6 = vadd.f32 %v89_v4, %v77_v5 }
  0xcb   :  { %v102_v7 = vpop.f32.mrf.mxu0 }
  0xcc   :  { %v83_v8 = vpack.c.bf16 %v78_v6, %v78_v6 }
  0xcd   :  { %v80_v9 = vpop.f32.mrf.mxu0 }
  0xce   :  { %84 = vst [vmem:[%s148_s3] sm:$0xf] %v83_v8 }
  0xcf   :  { %v103_v10 = vpop.f32.mrf.mxu0 }

// kernel: _lambda_.40
= control target key start
LH: loop header
LB: loop body
LE: loop exit
PB: predicated region body
PF: predicated region fallthrough
CT: control target
= control target key end

     0   :  { %v614_v35 = vmov 0.0   ;;  %vm615_vm0 = vmmov 0   ;;  %vm333_vm1 = vcmask 523264   ;;  %s767_s1 = inlined_call_operand.vmem [shape: bf16[576,128], index: 1, kind: input, shape index: {}]   ;;  %s768_s0 = inlined_call_operand.vmem [shape: bf16[8,576], index: 0, kind: input, shape index: {}]   ;;  %s769_s2 = inlined_call_operand.vmem [shape: f32[1,128], index: 2, kind: input, shape index: {}]   ;;  %s770_s3 = inlined_call_operand.vmem [shape: bf16[8,128], index: 3, kind: input, shape index: {}]   ;;  %s771_s4 = inlined_call_operand.vmem [shape: bf16[8,128], index: 4, kind: output, shape index: {}]  }
   0x1   :  { %v573_v0 = vld [vmem:[%s767_s1 + $0x78] sm:$0xff]   ;;  %v577_v4 = vld [vmem:[%s767_s1 + $0x70] sm:$0xff]   ;;  %v581_v8 = vld [vmem:[%s767_s1 + $0x68] sm:$0xff]  }
   0x2   :  { %v574_v1 = vld [vmem:[%s767_s1 + $0x38] sm:$0xff]   ;;  %510 = vmatprep.subr.bf16.mxu0 %v573_v0  ;;  %v578_v5 = vld [vmem:[%s767_s1 + $0x30] sm:$0xff]   ;;  %v582_v9 = vld [vmem:[%s767_s1 + $0x28] sm:$0xff]  }
   0x3   :  { %v575_v2 = vld [vmem:[%s767_s1 + $0xf8] sm:$0xff]   ;;  %511 = vmatpush3.bf16.msra.mxu0 %v574_v1  ;;  %v579_v6 = vld [vmem:[%s767_s1 + $0xf0] sm:$0xff]   ;;  %v583_v10 = vld [vmem:[%s767_s1 + $0xe8] sm:$0xff]  }
   0x4   :  { %v576_v3 = vld [vmem:[%s767_s1 + $0xb8] sm:$0xff]   ;;  %532 = vmatprep.subr.bf16.mxu1 %v575_v2  ;;  %512 = vmatprep.subr.bf16.mxu0 %v577_v4  ;;  %v580_v7 = vld [vmem:[%s767_s1 + $0xb0] sm:$0xff]   ;;  %v584_v11 = vld [vmem:[%s767_s1 + $0xa8] sm:$0xff]  }
   0x5   :  { %533 = vmatpush3.bf16.msra.mxu1 %v576_v3  ;;  %v585_v12 = vld [vmem:[%s767_s1 + $0x60] sm:$0xff]   ;;  %v589_v16 = vld [vmem:[%s767_s1 + $0x58] sm:$0xff]   ;;  %v593_v20 = vld [vmem:[%s767_s1 + $0x50] sm:$0xff]  }
   0x6   :  { %534 = vmatprep.subr.bf16.mxu1 %v579_v6  ;;  %v586_v13 = vld [vmem:[%s767_s1 + $0x20] sm:$0xff]   ;;  %v590_v17 = vld [vmem:[%s767_s1 + $0x18] sm:$0xff]   ;;  %v594_v21 = vld [vmem:[%s767_s1 + $0x10] sm:$0xff]  }
   0x7   :  { %513 = vmatpush3.bf16.msra.mxu0 %v578_v5  ;;  %v587_v14 = vld [vmem:[%s767_s1 + $0xe0] sm:$0xff]   ;;  %v591_v18 = vld [vmem:[%s767_s1 + $0xd8] sm:$0xff]   ;;  %v595_v22 = vld [vmem:[%s767_s1 + $0xd0] sm:$0xff]  }
   0x8   :  { %514 = vmatprep.subr.bf16.mxu0 %v581_v8  ;;  %v588_v15 = vld [vmem:[%s767_s1 + $0xa0] sm:$0xff]   ;;  %v592_v19 = vld [vmem:[%s767_s1 + $0x98] sm:$0xff]   ;;  %v596_v23 = vld [vmem:[%s767_s1 + $0x90] sm:$0xff]  }
   0x9   :  { %535 = vmatpush3.bf16.msra.mxu1 %v580_v7  ;;  %v597_v24 = vld [vmem:[%s767_s1 + $0x48] sm:$0xff]   ;;  %v601_v28 = vld [vmem:[%s767_s1 + $0x40] sm:$0xff]   ;;  %v610_v39 = vld [vmem:[%s767_s1 + $0x118] sm:$0xff]  }
   0xa   :  { %536 = vmatprep.subr.bf16.mxu1 %v583_v10  ;;  %v598_v25 = vld [vmem:[%s767_s1 + $0x8] sm:$0xff]   ;;  %v602_v29 = vld [vmem:[%s767_s1] sm:$0xff]   ;;  %v611_v40 = vld [vmem:[%s767_s1 + $0x110] sm:$0xff]  }
   0xb   :  { %515 = vmatpush3.bf16.msra.mxu0 %v582_v9  ;;  %v599_v26 = vld [vmem:[%s767_s1 + $0xc8] sm:$0xff]   ;;  %v603_v30 = vld [vmem:[%s767_s1 + $0xc0] sm:$0xff]   ;;  %v606_v43 = vld [vmem:[%s768_s0 + $0x10] ss:$0 sps:$4 sm:$0xff]  }
   0xc   :  { %516 = vmatprep.subr.bf16.mxu0 %v585_v12  ;;  %v600_v27 = vld [vmem:[%s767_s1 + $0x88] sm:$0xff]   ;;  %v18_v31 = vld [vmem:[%s768_s0] sm:$0xff] }
   0xd   :  { %537 = vmatpush3.bf16.msra.mxu1 %v584_v11  ;;  %v468_v32 = vcombine.low %v18_v31, %v18_v31  ;;  %v469_v33 = vcombine.high %v18_v31, %v18_v31  ;;  %v607_v34 = vld [vmem:[%s767_s1 + $0x80] sm:$0xff]   ;;  %v19_v36 = vld [vmem:[%s768_s0 + $0x8] sm:$0xff] }
   0xe   :  { %538 = vmatprep.subr.bf16.mxu1 %v587_v14  ;;  %v470_v37 = vcombine.low %v19_v36, %v19_v36  ;;  %v471_v38 = vcombine.high %v19_v36, %v19_v36  ;;  %v612_v41 = vld [vmem:[%s767_s1 + $0x108] sm:$0xff]   ;;  %v613_v42 = vld [vmem:[%s767_s1 + $0x100] sm:$0xff]  }
   0xf   :  { %517 = vmatpush3.bf16.msra.mxu0 %v586_v13  ;;  %369 = vmatprep.mubr.bf16.mxu0 %v469_v33  ;;  %v467_v52 = vld [vmem:[%s769_s2] ss:$0 sm:$0xff] }
  0x10   :  { %518 = vmatprep.subr.bf16.mxu0 %v589_v16  ;;  %409 = vmatprep.mubr.bf16.mxu1 %v471_v38  ;;  %v457_v56 = vld [vmem:[%s770_s3] sm:$0xf] }
  0x11   :  { %539 = vmatpush3.bf16.msra.mxu1 %v588_v15  ;;  %v458_v58 = vunpack.c.l.bf16 %v457_v56 }
  0x12   :  { %540 = vmatprep.subr.bf16.mxu1 %v591_v18 }
  0x13   :  { %519 = vmatpush3.bf16.msra.mxu0 %v590_v17 }
  0x14   :  { %520 = vmatprep.subr.bf16.mxu0 %v593_v20 }
  0x15   :  { %541 = vmatpush3.bf16.msra.mxu1 %v592_v19 }
  0x16   :  { %542 = vmatprep.subr.bf16.mxu1 %v595_v22 }
  0x17   :  { %521 = vmatpush3.bf16.msra.mxu0 %v594_v21 }
  0x18   :  { %522 = vmatprep.subr.bf16.mxu0 %v597_v24 }
  0x19   :  { %543 = vmatpush3.bf16.msra.mxu1 %v596_v23 }
  0x1a   :  { %544 = vmatprep.subr.bf16.mxu1 %v599_v26 }
  0x1b   :  { %523 = vmatpush3.bf16.msra.mxu0 %v598_v25 }
  0x1c   :  { %524 = vmatprep.subr.bf16.mxu0 %v601_v28 }
  0x1d   :  { %545 = vmatpush3.bf16.msra.mxu1 %v600_v27 }
  0x1e   :  { %546 = vmatprep.subr.bf16.mxu1 %v603_v30 }
  0x1f   :  { %525 = vmatpush3.bf16.msra.mxu0 %v602_v29 }
  0x20   :  { %559 = vmatprep.subr.bf16.mxu0 %v614_v35 }
  0x21   :  { %547 = vmatpush3.bf16.msra.mxu1 %v607_v34 }
  0x22   :  { %370 = vmatmul.mubr.bf16.vlgmr.msra.gmra.mxu0 %v468_v32 }
  0x23   :  { %560 = vmatpush3.bf16.msra.mxu0 %v610_v39  ;;  %567 = vmatprep.mubr.msk.bf16.mxu0 %vm615_vm0, %v614_v35 }
  0x24   :  { %410 = vmatmul.mubr.bf16.vlgmr.msra.gmra.mxu1 %v470_v37  ;;  %561 = vmatprep.subr.bf16.mxu0 %v614_v35 }
  0x27   :  { %562 = vmatpush3.bf16.msra.mxu0 %v611_v40 }
  0x28   :  { %563 = vmatprep.subr.bf16.mxu0 %v614_v35 }
  0x2b   :  { %564 = vmatpush3.bf16.msra.mxu0 %v612_v41 }
  0x2c   :  { %565 = vmatprep.subr.bf16.mxu0 %v614_v35 }
  0x2f   :  { %566 = vmatpush3.bf16.msra.mxu0 %v613_v42 }
  0x32   :  { %568 = vmatmul.mubr.msk.bf16.vlgmr.msra.gmra.mxu0 %vm333_vm1, %v606_v43 }
  0xe2   :  { %v526_v44 = vpop.f32.mrf.mxu0 }
  0xe4   :  { %v527_v45 = vpop.f32.mrf.mxu0  ;;  %v548_v46 = vpop.f32.mrf.mxu1 }
  0xe5   :  { %v528_v51 = vadd.f32 %v527_v45, %v526_v44 }
  0xe6   :  { %v529_v47 = vpop.f32.mrf.mxu0  ;;  %v549_v48 = vpop.f32.mrf.mxu1 }
  0xe7   :  { %v372_v54 = vadd.f32 %v528_v51, %v467_v52  ;;  %v550_v55 = vadd.f32 %v549_v48, %v548_v46 }
  0xe8   :  { %v530_v49 = vpop.f32.mrf.mxu0  ;;  %v551_v50 = vpop.f32.mrf.mxu1 }
  0xe9   :  { %v412_v57 = vadd.f32 %v550_v55, %v372_v54 }
  0xea   :  { %v552_v53 = vpop.f32.mrf.mxu1 }
  0xf2   :  { %v451_v59 = vpop.f32.mrf.mxu0 }
  0xf3   :  { %v452_v60 = vadd.f32 %v451_v59, %v412_v57 }
  0xf4   :  { %v569_v61 = vpop.f32.mrf.mxu0 }
  0xf5   :  { %v459_v62 = vadd.f32 %v458_v58, %v452_v60 }
  0xf6   :  { %v454_v63 = vpop.f32.mrf.mxu0 }
  0xf7   :  { %v460_v0 = vmax.f32 %v459_v62, 0.0 }
  0xf8   :  { %v570_v1 = vpop.f32.mrf.mxu0 }
  0xf9   :  { %v461_v2 = vpack.c.bf16 %v460_v0, %v460_v0 }
  0xfb   :  { %462 = vst [vmem:[%s771_s4] sm:$0xf] %v461_v2 }

// kernel: _lambda_.43
= control target key start
LH: loop header
LB: loop body
LE: loop exit
PB: predicated region body
PF: predicated region fallthrough
CT: control target
= control target key end

     0   :  { %v17_v2 = vlaneseq  ;;  %s86_s0 = inlined_call_operand.vmem [shape: bf16[2,1,128], index: 0, kind: input, shape index: {}]   ;;  %s87_s1 = inlined_call_operand.hbm [shape: f32[2,128], index: 1, kind: output, shape index: {}]  }
   0x1   :  { %v9_v0 = vld [vmem:[%s86_s0] sm:$0x1]  ;;  %v10_v1 = vld [vmem:[%s86_s0 + $0x1] sm:$0x1] }
   0x2   :  { %6 = vsyncpa [#allocation3], 0  ;;  %v11_v3 = vunpack.c.l.bf16 %v9_v0  ;;  %v12_v4 = vunpack.c.l.bf16 %v10_v1  ;;  %v18_v5 = vshrl.u32 %v17_v2, 7  ;;  %s66_s10 = smov [#allocation2]   ;;  %vm25_vm0 = vcmask 1041409  }
   0x3   :  { %s35_s11 = sshll.u32 %s66_s10, 4  ;;  %s36_s11 = int_to_ptr.vmem [resolvable:$true] %s35_s11 }
   0x4   :  { %v19_v6 = vsub.s32 0, %v18_v5  ;;  %s44_s12 = scalar_lea.vmem %s36_s11, 32  ;;  %p49_p1 = scmp.lt.s32.totalorder %s36_s11, %s36_s11 }
   0x5   :  { %p45_p0 = scmp.ne.s32.totalorder %s36_s11, %s44_s12  ;;  %p50_p2 = scmp.lt.s32.totalorder %s44_s12, %s44_s12 }
   0x6   :  { %v20_v7 = vrot.slane %v11_v3, %v19_v6  ;;  %v24_v8 = vrot.slane %v12_v4, %v19_v6 }
   0x7   :  { %p51_p3 = por %p50_p2, %p49_p1 }
   0x8   :  { %v26_v9 = vsel %vm25_vm0, %v24_v8, %v20_v7 }
   0x9   :  { %28 = vst [vmem:[#allocation2] sm:$0x3] %v26_v9  ;;  %p52_p4 = pnand %p51_p3, %p45_p0 }
   0xb   :  { %55 = shalt.err (!%p52_p4)
}
   0xc   :  { %38 = dma.vmem_to_hbm [thread:$0]  %s36_s11, 32, %s87_s1, [#allocation3]  }
   0xd   :  { %64 = dma.done.wait [#allocation3], 32  }
   0xe   :  { %65 = vsyncadd [#allocation3], 4294967264 }
   0xf   :  { %42 = vsyncpa [#allocation3], 1 }

// kernel: _lambda_.41
= control target key start
LH: loop header
LB: loop body
LE: loop exit
PB: predicated region body
PF: predicated region fallthrough
CT: control target
= control target key end

     0   :  { %v608_v35 = vmov 0.0   ;;  %vm609_vm0 = vmmov 0   ;;  %vm330_vm1 = vcmask 523264   ;;  %s753_s1 = inlined_call_operand.vmem [shape: bf16[576,128], index: 1, kind: input, shape index: {}]   ;;  %s754_s0 = inlined_call_operand.vmem [shape: bf16[8,576], index: 0, kind: input, shape index: {}]   ;;  %s755_s2 = inlined_call_operand.vmem [shape: f32[1,128], index: 2, kind: input, shape index: {}]   ;;  %s756_s3 = inlined_call_operand.vmem [shape: bf16[8,128], index: 3, kind: output, shape index: {}]  }
   0x1   :  { %v567_v0 = vld [vmem:[%s753_s1 + $0x78] sm:$0xff]   ;;  %v571_v4 = vld [vmem:[%s753_s1 + $0x70] sm:$0xff]   ;;  %v575_v8 = vld [vmem:[%s753_s1 + $0x68] sm:$0xff]  }
   0x2   :  { %v568_v1 = vld [vmem:[%s753_s1 + $0x38] sm:$0xff]   ;;  %504 = vmatprep.subr.bf16.mxu0 %v567_v0  ;;  %v572_v5 = vld [vmem:[%s753_s1 + $0x30] sm:$0xff]   ;;  %v576_v9 = vld [vmem:[%s753_s1 + $0x28] sm:$0xff]  }
   0x3   :  { %v569_v2 = vld [vmem:[%s753_s1 + $0xf8] sm:$0xff]   ;;  %505 = vmatpush3.bf16.msra.mxu0 %v568_v1  ;;  %v573_v6 = vld [vmem:[%s753_s1 + $0xf0] sm:$0xff]   ;;  %v577_v10 = vld [vmem:[%s753_s1 + $0xe8] sm:$0xff]  }
   0x4   :  { %v570_v3 = vld [vmem:[%s753_s1 + $0xb8] sm:$0xff]   ;;  %526 = vmatprep.subr.bf16.mxu1 %v569_v2  ;;  %506 = vmatprep.subr.bf16.mxu0 %v571_v4  ;;  %v574_v7 = vld [vmem:[%s753_s1 + $0xb0] sm:$0xff]   ;;  %v578_v11 = vld [vmem:[%s753_s1 + $0xa8] sm:$0xff]  }
   0x5   :  { %527 = vmatpush3.bf16.msra.mxu1 %v570_v3  ;;  %v579_v12 = vld [vmem:[%s753_s1 + $0x60] sm:$0xff]   ;;  %v583_v16 = vld [vmem:[%s753_s1 + $0x58] sm:$0xff]   ;;  %v587_v20 = vld [vmem:[%s753_s1 + $0x50] sm:$0xff]  }
   0x6   :  { %528 = vmatprep.subr.bf16.mxu1 %v573_v6  ;;  %v580_v13 = vld [vmem:[%s753_s1 + $0x20] sm:$0xff]   ;;  %v584_v17 = vld [vmem:[%s753_s1 + $0x18] sm:$0xff]   ;;  %v588_v21 = vld [vmem:[%s753_s1 + $0x10] sm:$0xff]  }
   0x7   :  { %507 = vmatpush3.bf16.msra.mxu0 %v572_v5  ;;  %v581_v14 = vld [vmem:[%s753_s1 + $0xe0] sm:$0xff]   ;;  %v585_v18 = vld [vmem:[%s753_s1 + $0xd8] sm:$0xff]   ;;  %v589_v22 = vld [vmem:[%s753_s1 + $0xd0] sm:$0xff]  }
   0x8   :  { %508 = vmatprep.subr.bf16.mxu0 %v575_v8  ;;  %v582_v15 = vld [vmem:[%s753_s1 + $0xa0] sm:$0xff]   ;;  %v586_v19 = vld [vmem:[%s753_s1 + $0x98] sm:$0xff]   ;;  %v590_v23 = vld [vmem:[%s753_s1 + $0x90] sm:$0xff]  }
   0x9   :  { %529 = vmatpush3.bf16.msra.mxu1 %v574_v7  ;;  %v591_v24 = vld [vmem:[%s753_s1 + $0x48] sm:$0xff]   ;;  %v595_v28 = vld [vmem:[%s753_s1 + $0x40] sm:$0xff]   ;;  %v604_v39 = vld [vmem:[%s753_s1 + $0x118] sm:$0xff]  }
   0xa   :  { %530 = vmatprep.subr.bf16.mxu1 %v577_v10  ;;  %v592_v25 = vld [vmem:[%s753_s1 + $0x8] sm:$0xff]   ;;  %v596_v29 = vld [vmem:[%s753_s1] sm:$0xff]   ;;  %v605_v40 = vld [vmem:[%s753_s1 + $0x110] sm:$0xff]  }
   0xb   :  { %509 = vmatpush3.bf16.msra.mxu0 %v576_v9  ;;  %v593_v26 = vld [vmem:[%s753_s1 + $0xc8] sm:$0xff]   ;;  %v597_v30 = vld [vmem:[%s753_s1 + $0xc0] sm:$0xff]   ;;  %v600_v43 = vld [vmem:[%s754_s0 + $0x10] ss:$0 sps:$4 sm:$0xff]  }
   0xc   :  { %510 = vmatprep.subr.bf16.mxu0 %v579_v12  ;;  %v594_v27 = vld [vmem:[%s753_s1 + $0x88] sm:$0xff]   ;;  %v15_v31 = vld [vmem:[%s754_s0] sm:$0xff] }
   0xd   :  { %531 = vmatpush3.bf16.msra.mxu1 %v578_v11  ;;  %v462_v32 = vcombine.low %v15_v31, %v15_v31  ;;  %v463_v33 = vcombine.high %v15_v31, %v15_v31  ;;  %v601_v34 = vld [vmem:[%s753_s1 + $0x80] sm:$0xff]   ;;  %v16_v36 = vld [vmem:[%s754_s0 + $0x8] sm:$0xff] }
   0xe   :  { %532 = vmatprep.subr.bf16.mxu1 %v581_v14  ;;  %v464_v37 = vcombine.low %v16_v36, %v16_v36  ;;  %v465_v38 = vcombine.high %v16_v36, %v16_v36  ;;  %v606_v41 = vld [vmem:[%s753_s1 + $0x108] sm:$0xff]   ;;  %v607_v42 = vld [vmem:[%s753_s1 + $0x100] sm:$0xff]  }
   0xf   :  { %511 = vmatpush3.bf16.msra.mxu0 %v580_v13  ;;  %366 = vmatprep.mubr.bf16.mxu0 %v463_v33  ;;  %v461_v52 = vld [vmem:[%s755_s2] ss:$0 sm:$0xff] }
  0x10   :  { %512 = vmatprep.subr.bf16.mxu0 %v583_v16  ;;  %406 = vmatprep.mubr.bf16.mxu1 %v465_v38 }
  0x11   :  { %533 = vmatpush3.bf16.msra.mxu1 %v582_v15 }
  0x12   :  { %534 = vmatprep.subr.bf16.mxu1 %v585_v18 }
  0x13   :  { %513 = vmatpush3.bf16.msra.mxu0 %v584_v17 }
  0x14   :  { %514 = vmatprep.subr.bf16.mxu0 %v587_v20 }
  0x15   :  { %535 = vmatpush3.bf16.msra.mxu1 %v586_v19 }
  0x16   :  { %536 = vmatprep.subr.bf16.mxu1 %v589_v22 }
  0x17   :  { %515 = vmatpush3.bf16.msra.mxu0 %v588_v21 }
  0x18   :  { %516 = vmatprep.subr.bf16.mxu0 %v591_v24 }
  0x19   :  { %537 = vmatpush3.bf16.msra.mxu1 %v590_v23 }
  0x1a   :  { %538 = vmatprep.subr.bf16.mxu1 %v593_v26 }
  0x1b   :  { %517 = vmatpush3.bf16.msra.mxu0 %v592_v25 }
  0x1c   :  { %518 = vmatprep.subr.bf16.mxu0 %v595_v28 }
  0x1d   :  { %539 = vmatpush3.bf16.msra.mxu1 %v594_v27 }
  0x1e   :  { %540 = vmatprep.subr.bf16.mxu1 %v597_v30 }
  0x1f   :  { %519 = vmatpush3.bf16.msra.mxu0 %v596_v29 }
  0x20   :  { %553 = vmatprep.subr.bf16.mxu0 %v608_v35 }
  0x21   :  { %541 = vmatpush3.bf16.msra.mxu1 %v601_v34 }
  0x22   :  { %367 = vmatmul.mubr.bf16.vlgmr.msra.gmra.mxu0 %v462_v32 }
  0x23   :  { %554 = vmatpush3.bf16.msra.mxu0 %v604_v39  ;;  %561 = vmatprep.mubr.msk.bf16.mxu0 %vm609_vm0, %v608_v35 }
  0x24   :  { %407 = vmatmul.mubr.bf16.vlgmr.msra.gmra.mxu1 %v464_v37  ;;  %555 = vmatprep.subr.bf16.mxu0 %v608_v35 }
  0x27   :  { %556 = vmatpush3.bf16.msra.mxu0 %v605_v40 }
  0x28   :  { %557 = vmatprep.subr.bf16.mxu0 %v608_v35 }
  0x2b   :  { %558 = vmatpush3.bf16.msra.mxu0 %v606_v41 }
  0x2c   :  { %559 = vmatprep.subr.bf16.mxu0 %v608_v35 }
  0x2f   :  { %560 = vmatpush3.bf16.msra.mxu0 %v607_v42 }
  0x32   :  { %562 = vmatmul.mubr.msk.bf16.vlgmr.msra.gmra.mxu0 %vm330_vm1, %v600_v43 }
  0xe2   :  { %v520_v44 = vpop.f32.mrf.mxu0 }
  0xe4   :  { %v521_v45 = vpop.f32.mrf.mxu0  ;;  %v542_v46 = vpop.f32.mrf.mxu1 }
  0xe5   :  { %v522_v51 = vadd.f32 %v521_v45, %v520_v44 }
  0xe6   :  { %v523_v47 = vpop.f32.mrf.mxu0  ;;  %v543_v48 = vpop.f32.mrf.mxu1 }
  0xe7   :  { %v369_v54 = vadd.f32 %v522_v51, %v461_v52  ;;  %v544_v55 = vadd.f32 %v543_v48, %v542_v46 }
  0xe8   :  { %v524_v49 = vpop.f32.mrf.mxu0  ;;  %v545_v50 = vpop.f32.mrf.mxu1 }
  0xe9   :  { %v409_v56 = vadd.f32 %v544_v55, %v369_v54 }
  0xea   :  { %v546_v53 = vpop.f32.mrf.mxu1 }
  0xf2   :  { %v448_v57 = vpop.f32.mrf.mxu0 }
  0xf3   :  { %v449_v58 = vadd.f32 %v448_v57, %v409_v56 }
  0xf4   :  { %v563_v59 = vpop.f32.mrf.mxu0 }
  0xf5   :  { %v454_v60 = vmax.f32 %v449_v58, 0.0 }
  0xf6   :  { %v451_v61 = vpop.f32.mrf.mxu0 }
  0xf7   :  { %v455_v62 = vpack.c.bf16 %v454_v60, %v454_v60 }
  0xf8   :  { %v564_v63 = vpop.f32.mrf.mxu0 }
  0xf9   :  { %456 = vst [vmem:[%s756_s3] sm:$0xf] %v455_v62 }

</bundles_post_ra>
